<compile_context>
chip_gen: v7x
topology: tpu7x:2x2x1
jax: 0.10.0
libtpu: 0.0.40
codegen_flags: <defaults>
</compile_context>

<pallas_src>
import functools

import jax
import jax.numpy as jnp
from jax.experimental import pallas as pl
from jax.experimental.pallas import tpu as pltpu


LANE = 128      # feature dims padded to multiples of the 128-wide lane dim
SUBLANE_BF16 = 16   # bf16 packs 16 rows per vreg


def _round_up(x, m):
    return (x + m - 1) // m * m


# ----------------------------------------------------------------------------
# Kernel: whole MLP for one row-tile of the batch.
# ----------------------------------------------------------------------------
def mlp_fused_kernel(*refs, num_mid, single_layer, ln_dim, eps):
    it = iter(refs)
    x_ref = next(it)
    h = x_ref[...]                                 # (tile_n, in_pad) bf16

    if single_layer:
        w_ref, b_ref = next(it), next(it)
        o_ref = next(it)
        z = jnp.dot(h, w_ref[...], preferred_element_type=jnp.float32)
        o_ref[...] = (z + b_ref[...]).astype(o_ref.dtype)
        return

    w0, b0, g0, bt0 = next(it), next(it), next(it), next(it)
    if num_mid > 0:
        wm, bm, gm, btm = next(it), next(it), next(it), next(it)
    wl, bl = next(it), next(it)
    o_ref = next(it)

    inv_d = jnp.float32(1.0 / ln_dim)

    def ln_relu(z, gamma, beta):
        # Padded feature columns of z are exactly zero (weights, bias padded
        # with zeros), so plain sums give statistics over the valid `ln_dim`
        # columns without masking.  Clamp var >= 0 (E[z^2]-mean^2 can go
        # slightly negative under cancellation).
        mean = jnp.sum(z, axis=-1, keepdims=True) * inv_d
        msq = jnp.sum(z * z, axis=-1, keepdims=True) * inv_d
        var = jnp.maximum(msq - mean * mean, 0.0)
        inv = jax.lax.rsqrt(var + eps)             # EUP slot
        # gamma folded into inv: one multiply-add epilogue; gamma/beta are zero
        # in padded columns so they stay exactly zero for the next layer.
        z = (z - mean) * (inv * gamma) + beta
        return jnp.maximum(z, 0.0)

    # First layer: narrow-K matmul (in_pad), then LN+ReLU.
    z = jnp.dot(h, w0[...], preferred_element_type=jnp.float32) + b0[...]
    h = ln_relu(z, g0[...], bt0[...])

    # Middle layers (static unroll).
    for l in range(num_mid):
        z = jnp.dot(h.astype(jnp.bfloat16), wm[l],
                    preferred_element_type=jnp.float32) + bm[l]
        h = ln_relu(z, gm[l], btm[l])

    # Final linear layer: narrow-N matmul (out_pad), no LN/ReLU.
    z = jnp.dot(h.astype(jnp.bfloat16), wl[...],
                preferred_element_type=jnp.float32) + bl[...]
    o_ref[...] = z.astype(o_ref.dtype)


# ----------------------------------------------------------------------------
# Helpers: padding, param packing, tiling, VMEM budget.
# ----------------------------------------------------------------------------
def _pad_matrix(w, rows, cols, dtype=jnp.bfloat16):
    out = jnp.zeros((rows, cols), jnp.float32)
    out = out.at[: w.shape[0], : w.shape[1]].set(w)
    return out.astype(dtype)


def _pad_rowvec(v, cols):
    out = jnp.zeros((1, cols), jnp.float32)
    return out.at[:, : v.shape[1]].set(v)


def _pick_tile_n(n):
    """16-row-aligned (bf16 sublane packing) tile minimizing batch padding,
    giving >= 2 grid steps when the batch is big enough (v7x megacore)."""
    n16 = _round_up(n, SUBLANE_BF16)
    if n16 <= 256:
        if n16 >= 64 and n16 % 32 == 0:
            return n16 // 2          # two grid steps, zero extra padding
        return n16                   # single tile for tiny batches
    best_key, best_tile = None, None
    for t in (512, 384, 256, 192, 128):
        pad = _round_up(n16, t)
        steps = pad // t
        key = (pad, 0 if steps >= 2 else 1, -t)   # min pad, then >=2 steps, then big tile
        if best_key is None or key < best_key:
            best_key, best_tile = key, t
    return best_tile


def _param_spec(shape, single_buffer):
    """Full-array resident parameter block.  index_map is constant across the
    row grid, so one buffer suffices (halves resident parameter VMEM)."""
    ndim = len(shape)
    idx = lambda i: (0,) * ndim
    if single_buffer:
        return pl.BlockSpec(shape, idx, pipeline_mode=pl.Buffered(1))
    return pl.BlockSpec(shape, idx)


def _vmem_cap_bytes():
    try:
        cap = getattr(pltpu.get_tpu_info(), "vmem_capacity_bytes", None)
        if cap:
            return int(cap)
    except Exception:
        pass
    return 64 << 20   # conservative default (v7x per-core VMEM)


# ----------------------------------------------------------------------------
# Wrapper: one pallas_call, grid over batch rows.
# ----------------------------------------------------------------------------
def mlp_forward(x, params, *, eps=1e-5, out_dtype=None):
    num_layers = len(params)
    n, input_dim = x.shape
    output_dim = params[-1][0].shape[1]
    out_dtype = jnp.dtype(out_dtype or x.dtype)

    in_pad = _round_up(input_dim, LANE)
    out_pad = _round_up(output_dim, LANE)

    if num_layers > 1:
        hidden_dim = params[0][0].shape[1]
        for (w, _, _, _) in params[:-1]:
            if w.shape[1] != hidden_dim:
                raise ValueError("all hidden layers must share the same width "
                                 "(required by the padded-column LayerNorm trick)")
        h_pad = _round_up(hidden_dim, LANE)
    else:
        hidden_dim, h_pad = output_dim, out_pad

    num_mid = max(num_layers - 2, 0)
    single_layer = num_layers == 1

    # --- batch tiling / input padding (narrow in_pad width, jnp.pad once) ---
    tile_n = _pick_tile_n(n)
    n_pad = _round_up(n, tile_n)
    x_p = jnp.pad(x.astype(jnp.bfloat16),
                  ((0, n_pad - n), (0, in_pad - input_dim)))

    # --- parameter packing -------------------------------------------------
    operands = [x_p]
    if single_layer:
        operands += [_pad_matrix(params[0][0], in_pad, out_pad),
                     _pad_rowvec(params[0][1], out_pad)]
    else:
        operands += [_pad_matrix(params[0][0], in_pad, h_pad),
                     _pad_rowvec(params[0][1], h_pad),
                     _pad_rowvec(params[0][2], h_pad),
                     _pad_rowvec(params[0][3], h_pad)]
        if num_mid > 0:
            mids = params[1:num_layers - 1]
            operands += [
                jnp.stack([_pad_matrix(w, h_pad, h_pad) for (w, _, _, _) in mids]),
                jnp.stack([_pad_rowvec(b, h_pad) for (_, b, _, _) in mids]),
                jnp.stack([_pad_rowvec(g, h_pad) for (_, _, g, _) in mids]),
                jnp.stack([_pad_rowvec(bt, h_pad) for (_, _, _, bt) in mids]),
            ]
        operands += [_pad_matrix(params[-1][0], h_pad, out_pad),
                     _pad_rowvec(params[-1][1], out_pad)]

    param_bytes = sum(int(a.size) * a.dtype.itemsize for a in operands[1:])

    # --- VMEM budget (generation-aware clamp, single-buffered params) -------
    tile_io_bytes = 2 * tile_n * in_pad * 2 + 2 * tile_n * out_pad * out_dtype.itemsize
    work_bytes = 8 * tile_n * max(in_pad, h_pad, out_pad) * 4   # f32 temporaries
    needed = param_bytes + tile_io_bytes + work_bytes + (4 << 20)
    cap = _vmem_cap_bytes()
    vmem_limit = int(max(min(needed, cap - (16 << 20)), 32 << 20))

    # --- cost estimate -------------------------------------------------------
    if single_layer:
        matmul_flops = 2 * n_pad * in_pad * out_pad
    else:
        matmul_flops = 2 * n_pad * (in_pad * h_pad + num_mid * h_pad * h_pad
                                    + h_pad * out_pad)
    cost = pl.CostEstimate(
        flops=int(matmul_flops),
        transcendentals=int(n_pad * max(num_layers - 1, 0)),
        bytes_accessed=int(x_p.size * 2 + n_pad * out_pad * out_dtype.itemsize
                           + param_bytes),
    )

    kernel = functools.partial(mlp_fused_kernel, num_mid=num_mid,
                               single_layer=single_layer,
                               ln_dim=hidden_dim, eps=eps)
    grid = (n_pad // tile_n,)

    def build_call(single_buffer):
        in_specs = [pl.BlockSpec((tile_n, in_pad), lambda i: (i, 0))]
        in_specs += [_param_spec(a.shape, single_buffer) for a in operands[1:]]
        return pl.pallas_call(
            kernel,
            out_shape=jax.ShapeDtypeStruct((n_pad, out_pad), out_dtype),
            grid_spec=pltpu.PrefetchScalarGridSpec(
                num_scalar_prefetch=0,
                grid=grid,
                in_specs=in_specs,
                out_specs=pl.BlockSpec((tile_n, out_pad), lambda i: (i, 0)),
            ),
            compiler_params=pltpu.CompilerParams(
                dimension_semantics=("parallel",),   # shard row tiles across TCs
                vmem_limit_bytes=vmem_limit,
            ),
            cost_estimate=cost,
        )

    try:
        out = build_call(single_buffer=True)(*operands)
    except Exception:
        # Fallback for jax versions without BlockSpec pipeline_mode / Buffered(1):
        # default double-buffered parameter blocks (correct, slightly more VMEM).
        out = build_call(single_buffer=False)(*operands)

    return out[:n, :output_dim]


# ----------------------------------------------------------------------------
# Parameter init (mirrors the shapes implied by the module __init__) + ref.
# ----------------------------------------------------------------------------
def init_mlp_params(key, input_dim, hidden_dim, output_dim, num_layers):
    dims = [input_dim] + [hidden_dim] * (num_layers - 1) + [output_dim]
    params = []
    for i in range(num_layers):
        key, wk, bk = jax.random.split(key, 3)
        d_in, d_out = dims[i], dims[i + 1]
        bound = 1.0 / jnp.sqrt(d_in)
        w = jax.random.uniform(wk, (d_in, d_out), jnp.float32, -bound, bound)
        b = jax.random.uniform(bk, (1, d_out), jnp.float32, -bound, bound)
        if i < num_layers - 1:
            gamma = jnp.ones((1, d_out), jnp.float32)
            beta = jnp.zeros((1, d_out), jnp.float32)
        else:
            gamma = beta = None
        params.append((w, b, gamma, beta))
    return params


def mlp_forward_ref(x, params, eps=1e-5):
    # Same bf16-matmul / f32-epilogue numerics as the kernel.
    h = x
    for (w, b, gamma, beta) in params[:-1]:
        z = jnp.dot(h.astype(jnp.bfloat16), w.astype(jnp.bfloat16),
                    preferred_element_type=jnp.float32) + b
        mean = jnp.mean(z, axis=-1, keepdims=True)
        var = jnp.mean((z - mean) ** 2, axis=-1, keepdims=True)
        z = (z - mean) * jax.lax.rsqrt(var + eps) * gamma + beta
        h = jnp.maximum(z, 0.0)
    w, b, _, _ = params[-1]
    return jnp.dot(h.astype(jnp.bfloat16), w.astype(jnp.bfloat16),
                   preferred_element_type=jnp.float32) + b


if __name__ == "__main__":
    key = jax.random.PRNGKey(0)
    key, xk, pk = jax.random.split(key, 3)

    batch = 8
    input_dim = 16
    hidden_dim = 32
    output_dim = 8
    num_layers = 3

    x = jax.random.normal(xk, (batch, input_dim), jnp.float32)

    # 3-layer config: first + middle + last layer code paths.
    params = init_mlp_params(pk, input_dim, hidden_dim, output_dim, num_layers)
    out = jax.block_until_ready(mlp_forward(x, params))
    ref = mlp_forward_ref(x, params)
    assert out.shape == (batch, output_dim)
    assert jnp.allclose(out, ref, atol=1e-2, rtol=1e-2), "mismatch vs reference (3-layer)"

    # 2-layer config: exercises the no-middle-layer path.
    params2 = init_mlp_params(pk, input_dim, hidden_dim, output_dim, 2)
    out2 = jax.block_until_ready(mlp_forward(x, params2))
    ref2 = mlp_forward_ref(x, params2)
    assert out2.shape == (batch, output_dim)
    assert jnp.allclose(out2, ref2, atol=1e-2, rtol=1e-2), "mismatch vs reference (2-layer)"

    print("KERNEL_OK")
</pallas_src>

<mosaic_0001>
module attributes {stable_mosaic.version = 11 : i64} {
  func.func @mlp_fused_kernel(%arg0: i32, %arg1: memref<16x128xbf16, #tpu.memory_space<vmem>>, %arg2: memref<128x128xbf16, #tpu.memory_space<vmem>>, %arg3: memref<1x128xf32, #tpu.memory_space<vmem>>, %arg4: memref<1x128xf32, #tpu.memory_space<vmem>>, %arg5: memref<1x128xf32, #tpu.memory_space<vmem>>, %arg6: memref<1x128x128xbf16, #tpu.memory_space<vmem>>, %arg7: memref<1x1x128xf32, #tpu.memory_space<vmem>>, %arg8: memref<1x1x128xf32, #tpu.memory_space<vmem>>, %arg9: memref<1x1x128xf32, #tpu.memory_space<vmem>>, %arg10: memref<128x128xbf16, #tpu.memory_space<vmem>>, %arg11: memref<1x128xf32, #tpu.memory_space<vmem>>, %arg12: memref<16x128xf32, #tpu.memory_space<vmem>>) attributes {dimension_semantics = [#tpu.dimension_semantics<parallel>], iteration_bounds = array<i64: 1>, scalar_prefetch = 0 : i64, scratch_operands = 0 : i64, tpu.core_type = #tpu.core_type<tc>, window_params = [{transform_indices = @transform_0, window_bounds = array<i64: 16, 128>}, {pipeline_mode = #tpu.pipeline_mode<synchronous>, transform_indices = @transform_1, window_bounds = array<i64: 128, 128>}, {pipeline_mode = #tpu.pipeline_mode<synchronous>, transform_indices = @transform_2, window_bounds = array<i64: 1, 128>}, {pipeline_mode = #tpu.pipeline_mode<synchronous>, transform_indices = @transform_3, window_bounds = array<i64: 1, 128>}, {pipeline_mode = #tpu.pipeline_mode<synchronous>, transform_indices = @transform_4, window_bounds = array<i64: 1, 128>}, {pipeline_mode = #tpu.pipeline_mode<synchronous>, transform_indices = @transform_5, window_bounds = array<i64: 1, 128, 128>}, {pipeline_mode = #tpu.pipeline_mode<synchronous>, transform_indices = @transform_6, window_bounds = array<i64: 1, 1, 128>}, {pipeline_mode = #tpu.pipeline_mode<synchronous>, transform_indices = @transform_7, window_bounds = array<i64: 1, 1, 128>}, {pipeline_mode = #tpu.pipeline_mode<synchronous>, transform_indices = @transform_8, window_bounds = array<i64: 1, 1, 128>}, {pipeline_mode = #tpu.pipeline_mode<synchronous>, transform_indices = @transform_9, window_bounds = array<i64: 128, 128>}, {pipeline_mode = #tpu.pipeline_mode<synchronous>, transform_indices = @transform_10, window_bounds = array<i64: 1, 128>}, {transform_indices = @transform_11, window_bounds = array<i64: 16, 128>}]} {
    %c0 = arith.constant 0 : index
    %c0_0 = arith.constant 0 : index
    %0 = vector.load %arg1[%c0, %c0_0] : memref<16x128xbf16, #tpu.memory_space<vmem>>, vector<16x128xbf16>
    %c0_1 = arith.constant 0 : index
    %c0_2 = arith.constant 0 : index
    %1 = vector.load %arg2[%c0_1, %c0_2] : memref<128x128xbf16, #tpu.memory_space<vmem>>, vector<128x128xbf16>
    %cst = arith.constant dense<0.000000e+00> : vector<16x128xf32>
    %2 = tpu.matmul %0, %1, %cst {dimension_numbers = #tpu.dot_dimension_numbers<[1], [0], [0], [1], [0, 0, 1, 1], [], []>} : vector<16x128xbf16>, vector<128x128xbf16>, vector<16x128xf32> -> vector<16x128xf32>
    %c0_3 = arith.constant 0 : index
    %c0_4 = arith.constant 0 : index
    %3 = vector.load %arg3[%c0_3, %c0_4] : memref<1x128xf32, #tpu.memory_space<vmem>>, vector<1x128xf32>
    %4 = vector.broadcast %3 : vector<1x128xf32> to vector<16x128xf32>
    %5 = arith.addf %2, %4 : vector<16x128xf32>
    %c0_5 = arith.constant 0 : index
    %c0_6 = arith.constant 0 : index
    %6 = vector.load %arg4[%c0_5, %c0_6] : memref<1x128xf32, #tpu.memory_space<vmem>>, vector<1x128xf32>
    %c0_7 = arith.constant 0 : index
    %c0_8 = arith.constant 0 : index
    %7 = vector.load %arg5[%c0_7, %c0_8] : memref<1x128xf32, #tpu.memory_space<vmem>>, vector<1x128xf32>
    %cst_9 = arith.constant dense<0.000000e+00> : vector<16xf32>
    %8 = vector.multi_reduction <add>, %5, %cst_9 [1] : vector<16x128xf32> to vector<16xf32>
    %9 = vector.shape_cast %8 : vector<16xf32> to vector<16x1xf32>
    %cst_10 = arith.constant 3.125000e-02 : f32
    %10 = vector.broadcast %cst_10 : f32 to vector<16x1xf32>
    %11 = arith.mulf %9, %10 : vector<16x1xf32>
    %12 = arith.mulf %5, %5 : vector<16x128xf32>
    %cst_11 = arith.constant dense<0.000000e+00> : vector<16xf32>
    %13 = vector.multi_reduction <add>, %12, %cst_11 [1] : vector<16x128xf32> to vector<16xf32>
    %14 = vector.shape_cast %13 : vector<16xf32> to vector<16x1xf32>
    %cst_12 = arith.constant 3.125000e-02 : f32
    %15 = vector.broadcast %cst_12 : f32 to vector<16x1xf32>
    %16 = arith.mulf %14, %15 : vector<16x1xf32>
    %17 = arith.mulf %11, %11 : vector<16x1xf32>
    %18 = arith.subf %16, %17 : vector<16x1xf32>
    %cst_13 = arith.constant 0.000000e+00 : f32
    %19 = vector.broadcast %cst_13 : f32 to vector<16x1xf32>
    %20 = arith.maximumf %18, %19 : vector<16x1xf32>
    %cst_14 = arith.constant 9.99999974E-6 : f32
    %21 = vector.broadcast %cst_14 : f32 to vector<16x1xf32>
    %22 = arith.addf %20, %21 : vector<16x1xf32>
    %23 = math.rsqrt %22 : vector<16x1xf32>
    %24 = vector.broadcast %11 : vector<16x1xf32> to vector<16x128xf32>
    %25 = arith.subf %5, %24 : vector<16x128xf32>
    %26 = vector.broadcast %23 : vector<16x1xf32> to vector<16x128xf32>
    %27 = vector.broadcast %6 : vector<1x128xf32> to vector<16x128xf32>
    %28 = arith.mulf %26, %27 : vector<16x128xf32>
    %29 = arith.mulf %25, %28 : vector<16x128xf32>
    %30 = vector.broadcast %7 : vector<1x128xf32> to vector<16x128xf32>
    %31 = arith.addf %29, %30 : vector<16x128xf32>
    %cst_15 = arith.constant 0.000000e+00 : f32
    %32 = vector.broadcast %cst_15 : f32 to vector<16x128xf32>
    %33 = arith.maximumf %31, %32 : vector<16x128xf32>
    %34 = arith.truncf %33 : vector<16x128xf32> to vector<16x128xbf16>
    %c0_16 = arith.constant 0 : index
    %c0_17 = arith.constant 0 : index
    %c0_18 = arith.constant 0 : index
    %35 = vector.load %arg6[%c0_16, %c0_17, %c0_18] : memref<1x128x128xbf16, #tpu.memory_space<vmem>>, vector<1x128x128xbf16>
    %36 = vector.shape_cast %35 : vector<1x128x128xbf16> to vector<128x128xbf16>
    %cst_19 = arith.constant dense<0.000000e+00> : vector<16x128xf32>
    %37 = tpu.matmul %34, %36, %cst_19 {dimension_numbers = #tpu.dot_dimension_numbers<[1], [0], [0], [1], [0, 0, 1, 1], [], []>} : vector<16x128xbf16>, vector<128x128xbf16>, vector<16x128xf32> -> vector<16x128xf32>
    %c0_20 = arith.constant 0 : index
    %c0_21 = arith.constant 0 : index
    %c0_22 = arith.constant 0 : index
    %38 = vector.load %arg7[%c0_20, %c0_21, %c0_22] : memref<1x1x128xf32, #tpu.memory_space<vmem>>, vector<1x1x128xf32>
    %39 = vector.shape_cast %38 : vector<1x1x128xf32> to vector<1x128xf32>
    %40 = vector.broadcast %39 : vector<1x128xf32> to vector<16x128xf32>
    %41 = arith.addf %37, %40 : vector<16x128xf32>
    %c0_23 = arith.constant 0 : index
    %c0_24 = arith.constant 0 : index
    %c0_25 = arith.constant 0 : index
    %42 = vector.load %arg8[%c0_23, %c0_24, %c0_25] : memref<1x1x128xf32, #tpu.memory_space<vmem>>, vector<1x1x128xf32>
    %43 = vector.shape_cast %42 : vector<1x1x128xf32> to vector<1x128xf32>
    %c0_26 = arith.constant 0 : index
    %c0_27 = arith.constant 0 : index
    %c0_28 = arith.constant 0 : index
    %44 = vector.load %arg9[%c0_26, %c0_27, %c0_28] : memref<1x1x128xf32, #tpu.memory_space<vmem>>, vector<1x1x128xf32>
    %45 = vector.shape_cast %44 : vector<1x1x128xf32> to vector<1x128xf32>
    %cst_29 = arith.constant dense<0.000000e+00> : vector<16xf32>
    %46 = vector.multi_reduction <add>, %41, %cst_29 [1] : vector<16x128xf32> to vector<16xf32>
    %47 = vector.shape_cast %46 : vector<16xf32> to vector<16x1xf32>
    %cst_30 = arith.constant 3.125000e-02 : f32
    %48 = vector.broadcast %cst_30 : f32 to vector<16x1xf32>
    %49 = arith.mulf %47, %48 : vector<16x1xf32>
    %50 = arith.mulf %41, %41 : vector<16x128xf32>
    %cst_31 = arith.constant dense<0.000000e+00> : vector<16xf32>
    %51 = vector.multi_reduction <add>, %50, %cst_31 [1] : vector<16x128xf32> to vector<16xf32>
    %52 = vector.shape_cast %51 : vector<16xf32> to vector<16x1xf32>
    %cst_32 = arith.constant 3.125000e-02 : f32
    %53 = vector.broadcast %cst_32 : f32 to vector<16x1xf32>
    %54 = arith.mulf %52, %53 : vector<16x1xf32>
    %55 = arith.mulf %49, %49 : vector<16x1xf32>
    %56 = arith.subf %54, %55 : vector<16x1xf32>
    %cst_33 = arith.constant 0.000000e+00 : f32
    %57 = vector.broadcast %cst_33 : f32 to vector<16x1xf32>
    %58 = arith.maximumf %56, %57 : vector<16x1xf32>
    %cst_34 = arith.constant 9.99999974E-6 : f32
    %59 = vector.broadcast %cst_34 : f32 to vector<16x1xf32>
    %60 = arith.addf %58, %59 : vector<16x1xf32>
    %61 = math.rsqrt %60 : vector<16x1xf32>
    %62 = vector.broadcast %49 : vector<16x1xf32> to vector<16x128xf32>
    %63 = arith.subf %41, %62 : vector<16x128xf32>
    %64 = vector.broadcast %61 : vector<16x1xf32> to vector<16x128xf32>
    %65 = vector.broadcast %43 : vector<1x128xf32> to vector<16x128xf32>
    %66 = arith.mulf %64, %65 : vector<16x128xf32>
    %67 = arith.mulf %63, %66 : vector<16x128xf32>
    %68 = vector.broadcast %45 : vector<1x128xf32> to vector<16x128xf32>
    %69 = arith.addf %67, %68 : vector<16x128xf32>
    %cst_35 = arith.constant 0.000000e+00 : f32
    %70 = vector.broadcast %cst_35 : f32 to vector<16x128xf32>
    %71 = arith.maximumf %69, %70 : vector<16x128xf32>
    %72 = arith.truncf %71 : vector<16x128xf32> to vector<16x128xbf16>
    %c0_36 = arith.constant 0 : index
    %c0_37 = arith.constant 0 : index
    %73 = vector.load %arg10[%c0_36, %c0_37] : memref<128x128xbf16, #tpu.memory_space<vmem>>, vector<128x128xbf16>
    %cst_38 = arith.constant dense<0.000000e+00> : vector<16x128xf32>
    %74 = tpu.matmul %72, %73, %cst_38 {dimension_numbers = #tpu.dot_dimension_numbers<[1], [0], [0], [1], [0, 0, 1, 1], [], []>} : vector<16x128xbf16>, vector<128x128xbf16>, vector<16x128xf32> -> vector<16x128xf32>
    %c0_39 = arith.constant 0 : index
    %c0_40 = arith.constant 0 : index
    %75 = vector.load %arg11[%c0_39, %c0_40] : memref<1x128xf32, #tpu.memory_space<vmem>>, vector<1x128xf32>
    %76 = vector.broadcast %75 : vector<1x128xf32> to vector<16x128xf32>
    %77 = arith.addf %74, %76 : vector<16x128xf32>
    %c0_41 = arith.constant 0 : index
    %c0_42 = arith.constant 0 : index
    %78 = vector.load %arg12[%c0_41, %c0_42] : memref<16x128xf32, #tpu.memory_space<vmem>>, vector<16x128xf32>
    tpu.vector_store %arg12[%c0_41, %c0_42], %77 {strides = array<i32>} : memref<16x128xf32, #tpu.memory_space<vmem>>, vector<16x128xf32>,
    return
  }
  func.func @transform_0(%arg0: i32) -> (i32, i32) {
    %c0_i32 = arith.constant 0 : i32
    %c0_i32_0 = arith.constant 0 : i32
    return %arg0, %c0_i32 : i32, i32
  }
  func.func @transform_1(%arg0: i32) -> (i32, i32) {
    %c0_i32 = arith.constant 0 : i32
    %c0_i32_0 = arith.constant 0 : i32
    %c0_i32_1 = arith.constant 0 : i32
    return %c0_i32, %c0_i32_0 : i32, i32
  }
  func.func @transform_2(%arg0: i32) -> (i32, i32) {
    %c0_i32 = arith.constant 0 : i32
    %c0_i32_0 = arith.constant 0 : i32
    %c0_i32_1 = arith.constant 0 : i32
    return %c0_i32, %c0_i32_0 : i32, i32
  }
  func.func @transform_3(%arg0: i32) -> (i32, i32) {
    %c0_i32 = arith.constant 0 : i32
    %c0_i32_0 = arith.constant 0 : i32
    %c0_i32_1 = arith.constant 0 : i32
    return %c0_i32, %c0_i32_0 : i32, i32
  }
  func.func @transform_4(%arg0: i32) -> (i32, i32) {
    %c0_i32 = arith.constant 0 : i32
    %c0_i32_0 = arith.constant 0 : i32
    %c0_i32_1 = arith.constant 0 : i32
    return %c0_i32, %c0_i32_0 : i32, i32
  }
  func.func @transform_5(%arg0: i32) -> (i32, i32, i32) {
    %c0_i32 = arith.constant 0 : i32
    %c0_i32_0 = arith.constant 0 : i32
    %c0_i32_1 = arith.constant 0 : i32
    %c0_i32_2 = arith.constant 0 : i32
    return %c0_i32, %c0_i32_0, %c0_i32_1 : i32, i32, i32
  }
  func.func @transform_6(%arg0: i32) -> (i32, i32, i32) {
    %c0_i32 = arith.constant 0 : i32
    %c0_i32_0 = arith.constant 0 : i32
    %c0_i32_1 = arith.constant 0 : i32
    %c0_i32_2 = arith.constant 0 : i32
    return %c0_i32, %c0_i32_0, %c0_i32_1 : i32, i32, i32
  }
  func.func @transform_7(%arg0: i32) -> (i32, i32, i32) {
    %c0_i32 = arith.constant 0 : i32
    %c0_i32_0 = arith.constant 0 : i32
    %c0_i32_1 = arith.constant 0 : i32
    %c0_i32_2 = arith.constant 0 : i32
    return %c0_i32, %c0_i32_0, %c0_i32_1 : i32, i32, i32
  }
  func.func @transform_8(%arg0: i32) -> (i32, i32, i32) {
    %c0_i32 = arith.constant 0 : i32
    %c0_i32_0 = arith.constant 0 : i32
    %c0_i32_1 = arith.constant 0 : i32
    %c0_i32_2 = arith.constant 0 : i32
    return %c0_i32, %c0_i32_0, %c0_i32_1 : i32, i32, i32
  }
  func.func @transform_9(%arg0: i32) -> (i32, i32) {
    %c0_i32 = arith.constant 0 : i32
    %c0_i32_0 = arith.constant 0 : i32
    %c0_i32_1 = arith.constant 0 : i32
    return %c0_i32, %c0_i32_0 : i32, i32
  }
  func.func @transform_10(%arg0: i32) -> (i32, i32) {
    %c0_i32 = arith.constant 0 : i32
    %c0_i32_0 = arith.constant 0 : i32
    %c0_i32_1 = arith.constant 0 : i32
    return %c0_i32, %c0_i32_0 : i32, i32
  }
  func.func @transform_11(%arg0: i32) -> (i32, i32) {
    %c0_i32 = arith.constant 0 : i32
    %c0_i32_0 = arith.constant 0 : i32
    return %arg0, %c0_i32 : i32, i32
  }
}

module attributes {stable_mosaic.version = 11 : i64} {
  func.func @mlp_fused_kernel(%arg0: i32, %arg1: memref<16x128xbf16, #tpu.memory_space<vmem>>, %arg2: memref<128x128xbf16, #tpu.memory_space<vmem>>, %arg3: memref<1x128xf32, #tpu.memory_space<vmem>>, %arg4: memref<1x128xf32, #tpu.memory_space<vmem>>, %arg5: memref<1x128xf32, #tpu.memory_space<vmem>>, %arg6: memref<1x128x128xbf16, #tpu.memory_space<vmem>>, %arg7: memref<1x1x128xf32, #tpu.memory_space<vmem>>, %arg8: memref<1x1x128xf32, #tpu.memory_space<vmem>>, %arg9: memref<1x1x128xf32, #tpu.memory_space<vmem>>, %arg10: memref<128x128xbf16, #tpu.memory_space<vmem>>, %arg11: memref<1x128xf32, #tpu.memory_space<vmem>>, %arg12: memref<16x128xf32, #tpu.memory_space<vmem>>) attributes {dimension_semantics = [#tpu.dimension_semantics<parallel>], iteration_bounds = array<i64: 1>, scalar_prefetch = 0 : i64, scratch_operands = 0 : i64, tpu.core_type = #tpu.core_type<tc>, window_params = [{transform_indices = @transform_0, window_bounds = array<i64: 16, 128>}, {pipeline_mode = #tpu.pipeline_mode<synchronous>, transform_indices = @transform_1, window_bounds = array<i64: 128, 128>}, {pipeline_mode = #tpu.pipeline_mode<synchronous>, transform_indices = @transform_2, window_bounds = array<i64: 1, 128>}, {pipeline_mode = #tpu.pipeline_mode<synchronous>, transform_indices = @transform_3, window_bounds = array<i64: 1, 128>}, {pipeline_mode = #tpu.pipeline_mode<synchronous>, transform_indices = @transform_4, window_bounds = array<i64: 1, 128>}, {pipeline_mode = #tpu.pipeline_mode<synchronous>, transform_indices = @transform_5, window_bounds = array<i64: 1, 128, 128>}, {pipeline_mode = #tpu.pipeline_mode<synchronous>, transform_indices = @transform_6, window_bounds = array<i64: 1, 1, 128>}, {pipeline_mode = #tpu.pipeline_mode<synchronous>, transform_indices = @transform_7, window_bounds = array<i64: 1, 1, 128>}, {pipeline_mode = #tpu.pipeline_mode<synchronous>, transform_indices = @transform_8, window_bounds = array<i64: 1, 1, 128>}, {pipeline_mode = #tpu.pipeline_mode<synchronous>, transform_indices = @transform_9, window_bounds = array<i64: 128, 128>}, {pipeline_mode = #tpu.pipeline_mode<synchronous>, transform_indices = @transform_10, window_bounds = array<i64: 1, 128>}, {transform_indices = @transform_11, window_bounds = array<i64: 16, 128>}]} {
    %c0 = arith.constant 0 : index
    %c0_0 = arith.constant 0 : index
    %0 = vector.load %arg1[%c0, %c0_0] : memref<16x128xbf16, #tpu.memory_space<vmem>>, vector<16x128xbf16>
    %c0_1 = arith.constant 0 : index
    %c0_2 = arith.constant 0 : index
    %1 = vector.load %arg2[%c0_1, %c0_2] : memref<128x128xbf16, #tpu.memory_space<vmem>>, vector<128x128xbf16>
    %cst = arith.constant dense<0.000000e+00> : vector<16x128xf32>
    %2 = tpu.matmul %0, %1, %cst {dimension_numbers = #tpu.dot_dimension_numbers<[1], [0], [0], [1], [0, 0, 1, 1], [], []>} : vector<16x128xbf16>, vector<128x128xbf16>, vector<16x128xf32> -> vector<16x128xf32>
    %c0_3 = arith.constant 0 : index
    %c0_4 = arith.constant 0 : index
    %3 = vector.load %arg3[%c0_3, %c0_4] : memref<1x128xf32, #tpu.memory_space<vmem>>, vector<1x128xf32>
    %4 = vector.broadcast %3 : vector<1x128xf32> to vector<16x128xf32>
    %5 = arith.addf %2, %4 : vector<16x128xf32>
    %c0_5 = arith.constant 0 : index
    %c0_6 = arith.constant 0 : index
    %6 = vector.load %arg4[%c0_5, %c0_6] : memref<1x128xf32, #tpu.memory_space<vmem>>, vector<1x128xf32>
    %c0_7 = arith.constant 0 : index
    %c0_8 = arith.constant 0 : index
    %7 = vector.load %arg5[%c0_7, %c0_8] : memref<1x128xf32, #tpu.memory_space<vmem>>, vector<1x128xf32>
    %cst_9 = arith.constant dense<0.000000e+00> : vector<16xf32>
    %8 = vector.multi_reduction <add>, %5, %cst_9 [1] : vector<16x128xf32> to vector<16xf32>
    %9 = vector.shape_cast %8 : vector<16xf32> to vector<16x1xf32>
    %cst_10 = arith.constant 3.125000e-02 : f32
    %10 = vector.broadcast %cst_10 : f32 to vector<16x1xf32>
    %11 = arith.mulf %9, %10 : vector<16x1xf32>
    %12 = arith.mulf %5, %5 : vector<16x128xf32>
    %cst_11 = arith.constant dense<0.000000e+00> : vector<16xf32>
    %13 = vector.multi_reduction <add>, %12, %cst_11 [1] : vector<16x128xf32> to vector<16xf32>
    %14 = vector.shape_cast %13 : vector<16xf32> to vector<16x1xf32>
    %cst_12 = arith.constant 3.125000e-02 : f32
    %15 = vector.broadcast %cst_12 : f32 to vector<16x1xf32>
    %16 = arith.mulf %14, %15 : vector<16x1xf32>
    %17 = arith.mulf %11, %11 : vector<16x1xf32>
    %18 = arith.subf %16, %17 : vector<16x1xf32>
    %cst_13 = arith.constant 0.000000e+00 : f32
    %19 = vector.broadcast %cst_13 : f32 to vector<16x1xf32>
    %20 = arith.maximumf %18, %19 : vector<16x1xf32>
    %cst_14 = arith.constant 9.99999974E-6 : f32
    %21 = vector.broadcast %cst_14 : f32 to vector<16x1xf32>
    %22 = arith.addf %20, %21 : vector<16x1xf32>
    %23 = math.rsqrt %22 : vector<16x1xf32>
    %24 = vector.broadcast %11 : vector<16x1xf32> to vector<16x128xf32>
    %25 = arith.subf %5, %24 : vector<16x128xf32>
    %26 = vector.broadcast %23 : vector<16x1xf32> to vector<16x128xf32>
    %27 = vector.broadcast %6 : vector<1x128xf32> to vector<16x128xf32>
    %28 = arith.mulf %26, %27 : vector<16x128xf32>
    %29 = arith.mulf %25, %28 : vector<16x128xf32>
    %30 = vector.broadcast %7 : vector<1x128xf32> to vector<16x128xf32>
    %31 = arith.addf %29, %30 : vector<16x128xf32>
    %cst_15 = arith.constant 0.000000e+00 : f32
    %32 = vector.broadcast %cst_15 : f32 to vector<16x128xf32>
    %33 = arith.maximumf %31, %32 : vector<16x128xf32>
    %34 = arith.truncf %33 : vector<16x128xf32> to vector<16x128xbf16>
    %c0_16 = arith.constant 0 : index
    %c0_17 = arith.constant 0 : index
    %c0_18 = arith.constant 0 : index
    %35 = vector.load %arg6[%c0_16, %c0_17, %c0_18] : memref<1x128x128xbf16, #tpu.memory_space<vmem>>, vector<1x128x128xbf16>
    %36 = vector.shape_cast %35 : vector<1x128x128xbf16> to vector<128x128xbf16>
    %cst_19 = arith.constant dense<0.000000e+00> : vector<16x128xf32>
    %37 = tpu.matmul %34, %36, %cst_19 {dimension_numbers = #tpu.dot_dimension_numbers<[1], [0], [0], [1], [0, 0, 1, 1], [], []>} : vector<16x128xbf16>, vector<128x128xbf16>, vector<16x128xf32> -> vector<16x128xf32>
    %c0_20 = arith.constant 0 : index
    %c0_21 = arith.constant 0 : index
    %c0_22 = arith.constant 0 : index
    %38 = vector.load %arg7[%c0_20, %c0_21, %c0_22] : memref<1x1x128xf32, #tpu.memory_space<vmem>>, vector<1x1x128xf32>
    %39 = vector.shape_cast %38 : vector<1x1x128xf32> to vector<1x128xf32>
    %40 = vector.broadcast %39 : vector<1x128xf32> to vector<16x128xf32>
    %41 = arith.addf %37, %40 : vector<16x128xf32>
    %c0_23 = arith.constant 0 : index
    %c0_24 = arith.constant 0 : index
    %c0_25 = arith.constant 0 : index
    %42 = vector.load %arg8[%c0_23, %c0_24, %c0_25] : memref<1x1x128xf32, #tpu.memory_space<vmem>>, vector<1x1x128xf32>
    %43 = vector.shape_cast %42 : vector<1x1x128xf32> to vector<1x128xf32>
    %c0_26 = arith.constant 0 : index
    %c0_27 = arith.constant 0 : index
    %c0_28 = arith.constant 0 : index
    %44 = vector.load %arg9[%c0_26, %c0_27, %c0_28] : memref<1x1x128xf32, #tpu.memory_space<vmem>>, vector<1x1x128xf32>
    %45 = vector.shape_cast %44 : vector<1x1x128xf32> to vector<1x128xf32>
    %cst_29 = arith.constant dense<0.000000e+00> : vector<16xf32>
    %46 = vector.multi_reduction <add>, %41, %cst_29 [1] : vector<16x128xf32> to vector<16xf32>
    %47 = vector.shape_cast %46 : vector<16xf32> to vector<16x1xf32>
    %cst_30 = arith.constant 3.125000e-02 : f32
    %48 = vector.broadcast %cst_30 : f32 to vector<16x1xf32>
    %49 = arith.mulf %47, %48 : vector<16x1xf32>
    %50 = arith.mulf %41, %41 : vector<16x128xf32>
    %cst_31 = arith.constant dense<0.000000e+00> : vector<16xf32>
    %51 = vector.multi_reduction <add>, %50, %cst_31 [1] : vector<16x128xf32> to vector<16xf32>
    %52 = vector.shape_cast %51 : vector<16xf32> to vector<16x1xf32>
    %cst_32 = arith.constant 3.125000e-02 : f32
    %53 = vector.broadcast %cst_32 : f32 to vector<16x1xf32>
    %54 = arith.mulf %52, %53 : vector<16x1xf32>
    %55 = arith.mulf %49, %49 : vector<16x1xf32>
    %56 = arith.subf %54, %55 : vector<16x1xf32>
    %cst_33 = arith.constant 0.000000e+00 : f32
    %57 = vector.broadcast %cst_33 : f32 to vector<16x1xf32>
    %58 = arith.maximumf %56, %57 : vector<16x1xf32>
    %cst_34 = arith.constant 9.99999974E-6 : f32
    %59 = vector.broadcast %cst_34 : f32 to vector<16x1xf32>
    %60 = arith.addf %58, %59 : vector<16x1xf32>
    %61 = math.rsqrt %60 : vector<16x1xf32>
    %62 = vector.broadcast %49 : vector<16x1xf32> to vector<16x128xf32>
    %63 = arith.subf %41, %62 : vector<16x128xf32>
    %64 = vector.broadcast %61 : vector<16x1xf32> to vector<16x128xf32>
    %65 = vector.broadcast %43 : vector<1x128xf32> to vector<16x128xf32>
    %66 = arith.mulf %64, %65 : vector<16x128xf32>
    %67 = arith.mulf %63, %66 : vector<16x128xf32>
    %68 = vector.broadcast %45 : vector<1x128xf32> to vector<16x128xf32>
    %69 = arith.addf %67, %68 : vector<16x128xf32>
    %cst_35 = arith.constant 0.000000e+00 : f32
    %70 = vector.broadcast %cst_35 : f32 to vector<16x128xf32>
    %71 = arith.maximumf %69, %70 : vector<16x128xf32>
    %72 = arith.truncf %71 : vector<16x128xf32> to vector<16x128xbf16>
    %c0_36 = arith.constant 0 : index
    %c0_37 = arith.constant 0 : index
    %73 = vector.load %arg10[%c0_36, %c0_37] : memref<128x128xbf16, #tpu.memory_space<vmem>>, vector<128x128xbf16>
    %cst_38 = arith.constant dense<0.000000e+00> : vector<16x128xf32>
    %74 = tpu.matmul %72, %73, %cst_38 {dimension_numbers = #tpu.dot_dimension_numbers<[1], [0], [0], [1], [0, 0, 1, 1], [], []>} : vector<16x128xbf16>, vector<128x128xbf16>, vector<16x128xf32> -> vector<16x128xf32>
    %c0_39 = arith.constant 0 : index
    %c0_40 = arith.constant 0 : index
    %75 = vector.load %arg11[%c0_39, %c0_40] : memref<1x128xf32, #tpu.memory_space<vmem>>, vector<1x128xf32>
    %76 = vector.broadcast %75 : vector<1x128xf32> to vector<16x128xf32>
    %77 = arith.addf %74, %76 : vector<16x128xf32>
    %c0_41 = arith.constant 0 : index
    %c0_42 = arith.constant 0 : index
    %78 = vector.load %arg12[%c0_41, %c0_42] : memref<16x128xf32, #tpu.memory_space<vmem>>, vector<16x128xf32>
    tpu.vector_store %arg12[%c0_41, %c0_42], %77 {strides = array<i32>} : memref<16x128xf32, #tpu.memory_space<vmem>>, vector<16x128xf32>,
    return
  }
  func.func @transform_0(%arg0: i32) -> (i32, i32) {
    %c0_i32 = arith.constant 0 : i32
    %c0_i32_0 = arith.constant 0 : i32
    return %arg0, %c0_i32 : i32, i32
  }
  func.func @transform_1(%arg0: i32) -> (i32, i32) {
    %c0_i32 = arith.constant 0 : i32
    %c0_i32_0 = arith.constant 0 : i32
    %c0_i32_1 = arith.constant 0 : i32
    return %c0_i32, %c0_i32_0 : i32, i32
  }
  func.func @transform_2(%arg0: i32) -> (i32, i32) {
    %c0_i32 = arith.constant 0 : i32
    %c0_i32_0 = arith.constant 0 : i32
    %c0_i32_1 = arith.constant 0 : i32
    return %c0_i32, %c0_i32_0 : i32, i32
  }
  func.func @transform_3(%arg0: i32) -> (i32, i32) {
    %c0_i32 = arith.constant 0 : i32
    %c0_i32_0 = arith.constant 0 : i32
    %c0_i32_1 = arith.constant 0 : i32
    return %c0_i32, %c0_i32_0 : i32, i32
  }
  func.func @transform_4(%arg0: i32) -> (i32, i32) {
    %c0_i32 = arith.constant 0 : i32
    %c0_i32_0 = arith.constant 0 : i32
    %c0_i32_1 = arith.constant 0 : i32
    return %c0_i32, %c0_i32_0 : i32, i32
  }
  func.func @transform_5(%arg0: i32) -> (i32, i32, i32) {
    %c0_i32 = arith.constant 0 : i32
    %c0_i32_0 = arith.constant 0 : i32
    %c0_i32_1 = arith.constant 0 : i32
    %c0_i32_2 = arith.constant 0 : i32
    return %c0_i32, %c0_i32_0, %c0_i32_1 : i32, i32, i32
  }
  func.func @transform_6(%arg0: i32) -> (i32, i32, i32) {
    %c0_i32 = arith.constant 0 : i32
    %c0_i32_0 = arith.constant 0 : i32
    %c0_i32_1 = arith.constant 0 : i32
    %c0_i32_2 = arith.constant 0 : i32
    return %c0_i32, %c0_i32_0, %c0_i32_1 : i32, i32, i32
  }
  func.func @transform_7(%arg0: i32) -> (i32, i32, i32) {
    %c0_i32 = arith.constant 0 : i32
    %c0_i32_0 = arith.constant 0 : i32
    %c0_i32_1 = arith.constant 0 : i32
    %c0_i32_2 = arith.constant 0 : i32
    return %c0_i32, %c0_i32_0, %c0_i32_1 : i32, i32, i32
  }
  func.func @transform_8(%arg0: i32) -> (i32, i32, i32) {
    %c0_i32 = arith.constant 0 : i32
    %c0_i32_0 = arith.constant 0 : i32
    %c0_i32_1 = arith.constant 0 : i32
    %c0_i32_2 = arith.constant 0 : i32
    return %c0_i32, %c0_i32_0, %c0_i32_1 : i32, i32, i32
  }
  func.func @transform_9(%arg0: i32) -> (i32, i32) {
    %c0_i32 = arith.constant 0 : i32
    %c0_i32_0 = arith.constant 0 : i32
    %c0_i32_1 = arith.constant 0 : i32
    return %c0_i32, %c0_i32_0 : i32, i32
  }
  func.func @transform_10(%arg0: i32) -> (i32, i32) {
    %c0_i32 = arith.constant 0 : i32
    %c0_i32_0 = arith.constant 0 : i32
    %c0_i32_1 = arith.constant 0 : i32
    return %c0_i32, %c0_i32_0 : i32, i32
  }
  func.func @transform_11(%arg0: i32) -> (i32, i32) {
    %c0_i32 = arith.constant 0 : i32
    %c0_i32_0 = arith.constant 0 : i32
    return %arg0, %c0_i32 : i32, i32
  }
}

</mosaic_0001>

<bundles_post_ra>
// kernel: tpu_custom_call.1
= control target key start
LH: loop header
LB: loop body
LE: loop exit
PB: predicated region body
PF: predicated region fallthrough
CT: control target
= control target key end

     0   :  { %16 = vsyncpa [#allocation3], 0  ;;  %s1047_s0 = inlined_call_operand.hbm [shape: bf16[16,128], index: 0, kind: input, shape index: {}]   ;;  %s1048_s1 = inlined_call_operand.hbm [shape: bf16[128,128], index: 1, kind: input, shape index: {}]   ;;  %s1049_s2 = inlined_call_operand.vmem [shape: f32[1,128], index: 2, kind: input, shape index: {}]   ;;  %s1050_s3 = inlined_call_operand.vmem [shape: f32[1,128], index: 3, kind: input, shape index: {}]   ;;  %s1051_s4 = inlined_call_operand.vmem [shape: f32[1,128], index: 4, kind: input, shape index: {}]   ;;  %s1052_s5 = inlined_call_operand.hbm [shape: bf16[1,128,128], index: 5, kind: input, shape index: {}]   ;;  %s1053_s6 = inlined_call_operand.vmem [shape: f32[1,1,128], index: 6, kind: input, shape index: {}]   ;;  %s1054_s7 = inlined_call_operand.vmem [shape: f32[1,1,128], index: 7, kind: input, shape index: {}]   ;;  %s1055_s8 = inlined_call_operand.vmem [shape: f32[1,1,128], index: 8, kind: input, shape index: {}]   ;;  %s1056_s9 = inlined_call_operand.hbm [shape: bf16[128,128], index: 9, kind: input, shape index: {}]   ;;  %s1057_s10 = inlined_call_operand.vmem [shape: f32[1,128], index: 10, kind: input, shape index: {}]   ;;  %s1058_s11 = inlined_call_operand.hbm [shape: f32[16,128], index: 11, kind: output, shape index: {}]  }
   0x1   :  { %17 = vsyncpa [#allocation6], 0 }
   0x2   :  { %18 = vsyncpa [#allocation9], 0 }
   0x3   :  { %19 = vsyncpa [#allocation4], 0  ;;  %s839_s17 = smov [#allocation5]   ;;  %s840_s19 = smov [#allocation2]  }
   0x4   :  { %s37_s18 = sshll.u32 %s839_s17, 4  ;;  %s25_s20 = sshll.u32 %s840_s19, 4  ;;  %s38_s18 = int_to_ptr.vmem [resolvable:$true] %s37_s18  ;;  %s910_s20 = int_to_ptr.vmem [resolvable:$true] %s25_s20 }
   0x5   :  { %s721_s23 = scalar_lea.hbm %s1048_s1, 1024 }
   0x6   :  { %p722_p0 = scmp.ne.s32.totalorder %s1048_s1, %s721_s23  ;;  %p725_p1 = scmp.lt.u32.totalorder %s721_s23, %s1048_s1 }
   0x8   :  { %p727_p2 = pnand %p725_p1, %p722_p0 }
   0xa   :  { %730 = shalt.err (!%p727_p2)
}
   0xb   :  { %s731_s28 = scalar_lea.vmem %s38_s18, 1024  ;;  %p736_p4 = scmp.lt.s32.totalorder %s38_s18, %s38_s18 }
   0xc   :  { %p732_p3 = scmp.ne.s32.totalorder %s38_s18, %s731_s28  ;;  %p737_p5 = scmp.lt.s32.totalorder %s731_s28, %s731_s28 }
   0xe   :  { %p738_p6 = por %p737_p5, %p736_p4 }
  0x10   :  { %p739_p7 = pnand %p738_p6, %p732_p3 }
  0x12   :  { %742 = shalt.err (!%p739_p7)
}
  0x13   :  { %s841_s29 = smov 64   ;;  %s842_s30 = smov 4  }
  0x14   :  { %43 = dma.hbm_to_vmem [thread:$0]  %s1048_s1, 1024, %s38_s18, [#allocation6], %s841_s29, %s841_s29, %s842_s30  }
  0x15   :  { %s743_s16 = scalar_lea.hbm %s1047_s0, 128 }
  0x16   :  { %p744_p8 = scmp.ne.s32.totalorder %s1047_s0, %s743_s16  ;;  %p747_p9 = scmp.lt.u32.totalorder %s743_s16, %s1047_s0 }
  0x18   :  { %p749_p10 = pnand %p747_p9, %p744_p8 }
  0x1a   :  { %752 = shalt.err (!%p749_p10)
}
  0x1b   :  { %s753_s23 = scalar_lea.vmem %s910_s20, 128  ;;  %p758_p12 = scmp.lt.s32.totalorder %s910_s20, %s910_s20 }
  0x1c   :  { %p754_p11 = scmp.ne.s32.totalorder %s910_s20, %s753_s23  ;;  %p759_p13 = scmp.lt.s32.totalorder %s753_s23, %s753_s23 }
  0x1e   :  { %p760_p0 = por %p759_p13, %p758_p12 }
  0x20   :  { %p761_p1 = pnand %p760_p0, %p754_p11 }
  0x22   :  { %764 = shalt.err (!%p761_p1)
}
  0x23   :  { %31 = dma.hbm_to_vmem [thread:$0]  %s1047_s0, 128, %s910_s20, [#allocation3], %s841_s29, %s841_s29, %s842_s30  }
  0x24   :  { %s843_s24 = smov [#allocation7]   ;;  %s844_s26 = smov [#allocation8]  }
  0x25   :  { %s55_s25 = sshll.u32 %s843_s24, 4  ;;  %s73_s27 = sshll.u32 %s844_s26, 4  ;;  %s56_s25 = int_to_ptr.vmem [resolvable:$true] %s55_s25  ;;  %s947_s27 = int_to_ptr.vmem [resolvable:$true] %s73_s27 }
  0x26   :  { %s765_s13 = scalar_lea.hbm %s1052_s5, 1024 }
  0x27   :  { %p766_p2 = scmp.ne.s32.totalorder %s1052_s5, %s765_s13  ;;  %p769_p3 = scmp.lt.u32.totalorder %s765_s13, %s1052_s5 }
  0x29   :  { %p771_p4 = pnand %p769_p3, %p766_p2 }
  0x2b   :  { %774 = shalt.err (!%p771_p4)
}
  0x2c   :  { %s775_s0 = scalar_lea.vmem %s56_s25, 1024  ;;  %p780_p6 = scmp.lt.s32.totalorder %s56_s25, %s56_s25 }
  0x2d   :  { %p776_p5 = scmp.ne.s32.totalorder %s56_s25, %s775_s0  ;;  %p781_p7 = scmp.lt.s32.totalorder %s775_s0, %s775_s0 }
  0x2f   :  { %p782_p8 = por %p781_p7, %p780_p6 }
  0x31   :  { %p783_p9 = pnand %p782_p8, %p776_p5 }
  0x33   :  { %786 = shalt.err (!%p783_p9)
}
  0x34   :  { %61 = dma.hbm_to_vmem [thread:$0]  %s1052_s5, 1024, %s56_s25, [#allocation6], %s841_s29, %s841_s29, %s842_s30  }
  0x35   :  { %s787_s23 = scalar_lea.hbm %s1056_s9, 1024 }
  0x36   :  { %p788_p10 = scmp.ne.s32.totalorder %s1056_s9, %s787_s23  ;;  %p791_p11 = scmp.lt.u32.totalorder %s787_s23, %s1056_s9 }
  0x38   :  { %p793_p12 = pnand %p791_p11, %p788_p10 }
  0x3a   :  { %796 = shalt.err (!%p793_p12)
}
  0x3b   :  { %s797_s28 = scalar_lea.vmem %s947_s27, 1024  ;;  %p802_p0 = scmp.lt.s32.totalorder %s947_s27, %s947_s27 }
  0x3c   :  { %p798_p13 = scmp.ne.s32.totalorder %s947_s27, %s797_s28  ;;  %p803_p1 = scmp.lt.s32.totalorder %s797_s28, %s797_s28 }
  0x3e   :  { %p804_p2 = por %p803_p1, %p802_p0 }
  0x40   :  { %p805_p3 = pnand %p804_p2, %p798_p13 }
  0x42   :  { %808 = shalt.err (!%p805_p3)
}
  0x43   :  { %79 = dma.hbm_to_vmem [thread:$0]  %s1056_s9, 1024, %s947_s27, [#allocation9], %s841_s29, %s841_s29, %s842_s30  }
  0x44   :  { %831 = dma.done.wait [#allocation3], 128  }
  0x45   :  { %832 = vsyncadd [#allocation3], 4294967168 }
  0x46   :  { %833 = dma.done.wait [#allocation6], 2048  }
  0x47   :  { %834 = vsyncadd [#allocation6], 4294965248 }
  0x48   :  { %835 = dma.done.wait [#allocation9], 1024  }
  0x49   :  { %836 = vsyncadd [#allocation9], 4294966272  ;;  %v845_v0 = vmov 0.0   ;;  %vm846_vm0 = vmmov 0   ;;  %v688_v1 = vld [vmem:[#allocation5] sm:$0xff]   ;;  %v689_v2 = vld [vmem:[#allocation5 + $0x8] sm:$0xff]  }
  0x4a   :  { %617 = vmatprep.subr.bf16.mxu0 %v845_v0  ;;  %633 = vmatprep.mubr.msk.bf16.mxu0 %vm846_vm0, %v845_v0  ;;  %v690_v3 = vld [vmem:[#allocation5 + $0x10] sm:$0xff]   ;;  %v691_v4 = vld [vmem:[#allocation5 + $0x18] sm:$0xff]   ;;  %v692_v5 = vld [vmem:[#allocation5 + $0x20] sm:$0xff]   ;;  %s847_s17 = smov [#allocation10]  }
  0x4b   :  { %637 = vmatprep.subr.bf16.mxu1 %v845_v0  ;;  %653 = vmatprep.mubr.msk.bf16.mxu1 %vm846_vm0, %v845_v0  ;;  %v693_v6 = vld [vmem:[#allocation5 + $0x28] sm:$0xff]   ;;  %v694_v7 = vld [vmem:[#allocation5 + $0x30] sm:$0xff]   ;;  %v695_v8 = vld [vmem:[#allocation5 + $0x38] sm:$0xff]   ;;  %s544_s0 = sshll.u32 %s847_s17, 4  ;;  %s545_s0 = int_to_ptr.vmem [resolvable:$true] %s544_s0 }
  0x4c   :  { %618 = vmatpush3.bf16.msra.mxu0 %v688_v1  ;;  %v696_v9 = vld [vmem:[#allocation2] sm:$0xff]   ;;  %v697_v19 = vld [vmem:[#allocation7] sm:$0xff]   ;;  %v698_v20 = vld [vmem:[#allocation7 + $0x8] sm:$0xff]   ;;  %p814_p5 = scmp.lt.s32.totalorder %s545_s0, %s545_s0 }
  0x4d   :  { %619 = vmatprep.subr.bf16.mxu0 %v845_v0  ;;  %v558_v10 = vld [vmem:[%s1049_s2] ss:$0 sm:$0xff]  ;;  %638 = vmatpush3.bf16.msra.mxu1 %v697_v19  ;;  %v699_v21 = vld [vmem:[#allocation7 + $0x10] sm:$0xff]   ;;  %v701_v23 = vld [vmem:[#allocation7 + $0x20] sm:$0xff]  }
  0x4e   :  { %639 = vmatprep.subr.bf16.mxu1 %v845_v0  ;;  %v700_v22 = vld [vmem:[#allocation7 + $0x18] sm:$0xff]   ;;  %v702_v24 = vld [vmem:[#allocation7 + $0x28] sm:$0xff]   ;;  %v703_v25 = vld [vmem:[#allocation7 + $0x30] sm:$0xff]  }
  0x4f   :  { %v704_v26 = vld [vmem:[#allocation7 + $0x38] sm:$0xff]  }
  0x50   :  { %620 = vmatpush3.bf16.msra.mxu0 %v689_v2  ;;  %v568_v43 = vld [vmem:[%s1050_s3] ss:$0 sm:$0xff] }
  0x51   :  { %621 = vmatprep.subr.bf16.mxu0 %v845_v0  ;;  %640 = vmatpush3.bf16.msra.mxu1 %v698_v20  ;;  %v569_v49 = vld [vmem:[%s1051_s4] ss:$0 sm:$0xff] }
  0x52   :  { %641 = vmatprep.subr.bf16.mxu1 %v845_v0  ;;  %v570_v58 = vld [vmem:[%s1053_s6] ss:$0 sm:$0xff] }
  0x54   :  { %622 = vmatpush3.bf16.msra.mxu0 %v690_v3 }
  0x55   :  { %623 = vmatprep.subr.bf16.mxu0 %v845_v0  ;;  %642 = vmatpush3.bf16.msra.mxu1 %v699_v21 }
  0x56   :  { %643 = vmatprep.subr.bf16.mxu1 %v845_v0 }
  0x58   :  { %624 = vmatpush3.bf16.msra.mxu0 %v691_v4  ;;  %v705_v4 = vld [vmem:[#allocation8] sm:$0xff]  }
  0x59   :  { %625 = vmatprep.subr.bf16.mxu0 %v845_v0  ;;  %644 = vmatpush3.bf16.msra.mxu1 %v700_v22 }
  0x5a   :  { %645 = vmatprep.subr.bf16.mxu1 %v845_v0 }
  0x5c   :  { %626 = vmatpush3.bf16.msra.mxu0 %v692_v5  ;;  %v706_v5 = vld [vmem:[#allocation8 + $0x8] sm:$0xff]  }
  0x5d   :  { %627 = vmatprep.subr.bf16.mxu0 %v845_v0  ;;  %646 = vmatpush3.bf16.msra.mxu1 %v701_v23 }
  0x5e   :  { %647 = vmatprep.subr.bf16.mxu1 %v845_v0 }
  0x60   :  { %628 = vmatpush3.bf16.msra.mxu0 %v693_v6  ;;  %v707_v6 = vld [vmem:[#allocation8 + $0x10] sm:$0xff]  }
  0x61   :  { %629 = vmatprep.subr.bf16.mxu0 %v845_v0  ;;  %648 = vmatpush3.bf16.msra.mxu1 %v702_v24 }
  0x62   :  { %649 = vmatprep.subr.bf16.mxu1 %v845_v0 }
  0x64   :  { %630 = vmatpush3.bf16.msra.mxu0 %v694_v7  ;;  %v708_v7 = vld [vmem:[#allocation8 + $0x18] sm:$0xff]  }
  0x65   :  { %631 = vmatprep.subr.bf16.mxu0 %v845_v0  ;;  %650 = vmatpush3.bf16.msra.mxu1 %v703_v25 }
  0x66   :  { %651 = vmatprep.subr.bf16.mxu1 %v845_v0 }
  0x68   :  { %632 = vmatpush3.bf16.msra.mxu0 %v695_v8  ;;  %v709_v8 = vld [vmem:[#allocation8 + $0x20] sm:$0xff]  }
  0x69   :  { %657 = vmatprep.subr.bf16.mxu0 %v845_v0  ;;  %652 = vmatpush3.bf16.msra.mxu1 %v704_v26 }
  0x6b   :  { %634 = vmatmul.mubr.bf16.vlgmr.msra.gmra.mrb[0].mxu0 %v696_v9  ;;  %v710_v9 = vld [vmem:[#allocation8 + $0x28] sm:$0xff]  }
  0x6c   :  { %673 = vmatprep.mubr.msk.bf16.mxu0 %vm846_vm0, %v845_v0  ;;  %658 = vmatpush3.bf16.msra.mxu0 %v705_v4 }
  0x6d   :  { %659 = vmatprep.subr.bf16.mxu0 %v845_v0 }
  0x70   :  { %660 = vmatpush3.bf16.msra.mxu0 %v706_v5 }
  0x71   :  { %661 = vmatprep.subr.bf16.mxu0 %v845_v0 }
  0x74   :  { %662 = vmatpush3.bf16.msra.mxu0 %v707_v6 }
  0x75   :  { %663 = vmatprep.subr.bf16.mxu0 %v845_v0 }
  0x78   :  { %664 = vmatpush3.bf16.msra.mxu0 %v708_v7 }
  0x79   :  { %665 = vmatprep.subr.bf16.mxu0 %v845_v0 }
  0x7c   :  { %666 = vmatpush3.bf16.msra.mxu0 %v709_v8 }
  0x7d   :  { %667 = vmatprep.subr.bf16.mxu0 %v845_v0 }
  0x80   :  { %668 = vmatpush3.bf16.msra.mxu0 %v710_v9 }
  0x81   :  { %669 = vmatprep.subr.bf16.mxu0 %v845_v0 }
 0x13e   :  { %v208_v11 = vpop.f32.mrb[0].mxu0 }
 0x13f   :  { %v209_v12 = vadd.f32 %v558_v10, %v208_v11  ;;  %v635_v13 = vpop.f32.mrb[1].mxu0  ;;  %v712_v11 = vld [vmem:[#allocation8 + $0x38] sm:$0xff]  }
 0x140   :  { %v211_v14 = vpop.f32.mrb[2].mxu0 }
 0x141   :  { %v212_v15 = vadd.f32 %v558_v10, %v211_v14  ;;  %217 = vadd.xlane.f32.xlu0 %v209_v12  ;;  %v636_v16 = vpop.f32.mrb[3].mxu0  ;;  %v223_v17 = vmul.f32 %v209_v12, %v209_v12  ;;  %v711_v10 = vld [vmem:[#allocation8 + $0x30] sm:$0xff]  }
 0x142   :  { %670 = vmatpush3.bf16.msra.mxu0 %v711_v10 }
 0x143   :  { %225 = vadd.xlane.f32.xlu1 %v223_v17  ;;  %v224_v18 = vmul.f32 %v212_v15, %v212_v15  ;;  %671 = vmatprep.subr.bf16.mxu0 %v845_v0  ;;  %v579_v0 = vld [vmem:[%s1054_s7] ss:$0 sm:$0xff] }
 0x145   :  { %219 = vadd.xlane.f32.xlu0 %v212_v15 }
 0x146   :  { %672 = vmatpush3.bf16.msra.mxu0 %v712_v11 }
 0x147   :  { %227 = vadd.xlane.f32.xlu1 %v224_v18 }
 0x1ce   :  { %v218_v27 = vpop.xlane.xlu0 %217 }
 0x1cf   :  { %v221_v28 = vmul.f32 0.03125, %v218_v27 }
 0x1d0   :  { %v226_v29 = vpop.xlane.xlu1 %225 }
 0x1d1   :  { %v231_v30 = vmul.f32 %v221_v28, %v221_v28  ;;  %v229_v31 = vmul.f32 0.03125, %v226_v29  ;;  %v241_v45 = vsub.f32 %v209_v12, %v221_v28 }
 0x1d2   :  { %v220_v32 = vpop.xlane.xlu0 %219 }
 0x1d3   :  { %v233_v33 = vsub.f32 %v229_v31, %v231_v30  ;;  %v222_v34 = vmul.f32 0.03125, %v220_v32  ;;  %v580_v32 = vld [vmem:[%s1055_s8] ss:$0 sm:$0xff]  ;;  %s809_s8 = scalar_lea.vmem %s545_s0, 256 }
 0x1d4   :  { %v228_v35 = vpop.xlane.xlu1 %227  ;;  %p810_p4 = scmp.ne.s32.totalorder %s545_s0, %s809_s8  ;;  %p815_p6 = scmp.lt.s32.totalorder %s809_s8, %s809_s8 }
 0x1d5   :  { %v235_v36 = vmax.f32 %v233_v33, 0.0  ;;  %v232_v37 = vmul.f32 %v222_v34, %v222_v34  ;;  %v230_v38 = vmul.f32 0.03125, %v228_v35  ;;  %v242_v50 = vsub.f32 %v212_v15, %v222_v34 }
 0x1d6   :  { %p816_p7 = por %p815_p6, %p814_p5 }
 0x1d7   :  { %v237_v39 = vadd.f32 1e-05, %v235_v36  ;;  %v234_v40 = vsub.f32 %v230_v38, %v232_v37 }
 0x1d8   :  { %p817_p8 = pnand %p816_p7, %p810_p4 }
 0x1d9   :  { %713 = vrsqrt.f32 %v237_v39  ;;  %v236_v41 = vmax.f32 %v234_v40, 0.0 }
 0x1db   :  { %v238_v42 = vadd.f32 1e-05, %v236_v41 }
 0x1dd   :  { %715 = vrsqrt.f32 %v238_v42  ;;  %v581_v42 = vld [vmem:[%s1057_s10] ss:$0 sm:$0xff] }
 0x1e3   :  { %v714_v44 = vpop.eup %713 }
 0x1e4   :  { %v249_v46 = vmul.f32 %v714_v44, %v568_v43 }
 0x1e6   :  { %v251_v47 = vmul.f32 %v249_v46, %v241_v45 }
 0x1e7   :  { %v716_v48 = vpop.eup %715 }
 0x1e8   :  { %v250_v51 = vmul.f32 %v716_v48, %v568_v43  ;;  %v259_v53 = vadd.f32 %v569_v49, %v251_v47 }
 0x1ea   :  { %v252_v52 = vmul.f32 %v250_v51, %v242_v50  ;;  %v261_v55 = vmax.f32 %v259_v53, 0.0 }
 0x1ec   :  { %v260_v54 = vadd.f32 %v569_v49, %v252_v52 }
 0x1ee   :  { %v262_v56 = vmax.f32 %v260_v54, 0.0 }
 0x1f0   :  { %v263_v57 = vpack.c.bf16 %v262_v56, %v261_v55 }
 0x1f2   :  { %654 = vmatmul.mubr.bf16.vlgmr.msra.gmra.mrb[0].mxu1 %v263_v57 }
 0x2c5   :  { %v369_v59 = vpop.f32.mrb[0].mxu1 }
 0x2c6   :  { %v370_v60 = vadd.f32 %v570_v58, %v369_v59  ;;  %v655_v61 = vpop.f32.mrb[1].mxu1 }
 0x2c7   :  { %v372_v62 = vpop.f32.mrb[2].mxu1 }
 0x2c8   :  { %v373_v63 = vadd.f32 %v570_v58, %v372_v62  ;;  %378 = vadd.xlane.f32.xlu0 %v370_v60  ;;  %v656_v1 = vpop.f32.mrb[3].mxu1  ;;  %v384_v2 = vmul.f32 %v370_v60, %v370_v60 }
 0x2ca   :  { %380 = vadd.xlane.f32.xlu1 %v373_v63  ;;  %v385_v3 = vmul.f32 %v373_v63, %v373_v63 }
 0x2cc   :  { %386 = vadd.xlane.f32.xlu0 %v384_v2 }
 0x2ce   :  { %388 = vadd.xlane.f32.xlu1 %v385_v3 }
 0x355   :  { %v379_v12 = vpop.xlane.xlu0 %378 }
 0x356   :  { %v382_v13 = vmul.f32 0.03125, %v379_v12 }
 0x357   :  { %v381_v14 = vpop.xlane.xlu1 %380 }
 0x358   :  { %v383_v15 = vmul.f32 0.03125, %v381_v14  ;;  %v392_v17 = vmul.f32 %v382_v13, %v382_v13  ;;  %v402_v29 = vsub.f32 %v370_v60, %v382_v13 }
 0x359   :  { %v387_v16 = vpop.xlane.xlu0 %386 }
 0x35a   :  { %v390_v18 = vmul.f32 0.03125, %v387_v16  ;;  %v393_v20 = vmul.f32 %v383_v15, %v383_v15  ;;  %v403_v33 = vsub.f32 %v373_v63, %v383_v15 }
 0x35b   :  { %v389_v19 = vpop.xlane.xlu1 %388 }
 0x35c   :  { %v394_v21 = vsub.f32 %v390_v18, %v392_v17  ;;  %v391_v22 = vmul.f32 0.03125, %v389_v19 }
 0x35e   :  { %v396_v23 = vmax.f32 %v394_v21, 0.0  ;;  %v395_v24 = vsub.f32 %v391_v22, %v393_v20 }
 0x360   :  { %v398_v25 = vadd.f32 1e-05, %v396_v23  ;;  %v397_v26 = vmax.f32 %v395_v24, 0.0 }
 0x362   :  { %717 = vrsqrt.f32 %v398_v25  ;;  %v399_v27 = vadd.f32 1e-05, %v397_v26 }
 0x364   :  { %719 = vrsqrt.f32 %v399_v27 }
 0x36c   :  { %v718_v28 = vpop.eup %717 }
 0x36d   :  { %v410_v30 = vmul.f32 %v718_v28, %v579_v0 }
 0x36e   :  { %v720_v31 = vpop.eup %719 }
 0x36f   :  { %v411_v34 = vmul.f32 %v720_v31, %v579_v0  ;;  %v412_v35 = vmul.f32 %v410_v30, %v402_v29 }
 0x371   :  { %v413_v36 = vmul.f32 %v411_v34, %v403_v33  ;;  %v420_v37 = vadd.f32 %v580_v32, %v412_v35 }
 0x373   :  { %v421_v38 = vadd.f32 %v580_v32, %v413_v36  ;;  %v422_v39 = vmax.f32 %v420_v37, 0.0 }
 0x375   :  { %v423_v40 = vmax.f32 %v421_v38, 0.0 }
 0x377   :  { %v424_v41 = vpack.c.bf16 %v423_v40, %v422_v39 }
 0x379   :  { %674 = vmatmul.mubr.bf16.vlgmr.msra.gmra.mrb[4].mxu0 %v424_v41 }
 0x44c   :  { %v530_v43 = vpop.f32.mrb[4].mxu0 }
 0x44d   :  { %v531_v44 = vadd.f32 %v581_v42, %v530_v43  ;;  %v675_v45 = vpop.f32.mrb[5].mxu0 }
 0x44e   :  { %v533_v46 = vpop.f32.mrb[6].mxu0 }
 0x44f   :  { %537 = vst [vmem:[#allocation10] sm:$0xff] %v531_v44  ;;  %v534_v47 = vadd.f32 %v581_v42, %v533_v46  ;;  %v676_v48 = vpop.f32.mrb[7].mxu0 }
 0x451   :  { %538 = vst [vmem:[#allocation10 + $0x8] sm:$0xff] %v534_v47 }
 0x452   :  { %820 = shalt.err (!%p817_p8)
}
 0x453   :  { %s821_s19 = scalar_lea.hbm %s1058_s11, 256 }
 0x454   :  { %p822_p9 = scmp.ne.s32.totalorder %s1058_s11, %s821_s19  ;;  %p825_p10 = scmp.lt.u32.totalorder %s821_s19, %s1058_s11 }
 0x456   :  { %p827_p11 = pnand %p825_p10, %p822_p9 }
 0x458   :  { %830 = shalt.err (!%p827_p11)
}
 0x459   :  { %s848_s18 = smov 128   ;;  %s849_s24 = smov 8  }
 0x45a   :  { %550 = dma.vmem_to_hbm [thread:$0]  %s545_s0, 256, %s1058_s11, [#allocation4], %s848_s18, %s848_s18, %s849_s24  }
 0x45b   :  { %837 = dma.done.wait [#allocation4], 256  }
 0x45c   :  { %838 = vsyncadd [#allocation4], 4294967040 }
 0x45d   :  { %554 = vsyncpa [#allocation3], 1 }
 0x45e   :  { %555 = vsyncpa [#allocation6], 1 }
 0x45f   :  { %556 = vsyncpa [#allocation9], 1 }
 0x460   :  { %557 = vsyncpa [#allocation4], 1 }

// kernel: tpu_custom_call.1
= control target key start
LH: loop header
LB: loop body
LE: loop exit
PB: predicated region body
PF: predicated region fallthrough
CT: control target
= control target key end

     0   :  { %16 = vsyncpa [#allocation3], 0  ;;  %s1047_s0 = inlined_call_operand.hbm [shape: bf16[16,128], index: 0, kind: input, shape index: {}]   ;;  %s1048_s1 = inlined_call_operand.hbm [shape: bf16[128,128], index: 1, kind: input, shape index: {}]   ;;  %s1049_s2 = inlined_call_operand.vmem [shape: f32[1,128], index: 2, kind: input, shape index: {}]   ;;  %s1050_s3 = inlined_call_operand.vmem [shape: f32[1,128], index: 3, kind: input, shape index: {}]   ;;  %s1051_s4 = inlined_call_operand.vmem [shape: f32[1,128], index: 4, kind: input, shape index: {}]   ;;  %s1052_s5 = inlined_call_operand.hbm [shape: bf16[1,128,128], index: 5, kind: input, shape index: {}]   ;;  %s1053_s6 = inlined_call_operand.vmem [shape: f32[1,1,128], index: 6, kind: input, shape index: {}]   ;;  %s1054_s7 = inlined_call_operand.vmem [shape: f32[1,1,128], index: 7, kind: input, shape index: {}]   ;;  %s1055_s8 = inlined_call_operand.vmem [shape: f32[1,1,128], index: 8, kind: input, shape index: {}]   ;;  %s1056_s9 = inlined_call_operand.hbm [shape: bf16[128,128], index: 9, kind: input, shape index: {}]   ;;  %s1057_s10 = inlined_call_operand.vmem [shape: f32[1,128], index: 10, kind: input, shape index: {}]   ;;  %s1058_s11 = inlined_call_operand.hbm [shape: f32[16,128], index: 11, kind: output, shape index: {}]  }
   0x1   :  { %17 = vsyncpa [#allocation6], 0 }
   0x2   :  { %18 = vsyncpa [#allocation9], 0 }
   0x3   :  { %19 = vsyncpa [#allocation4], 0  ;;  %s839_s17 = smov [#allocation5]   ;;  %s840_s19 = smov [#allocation2]  }
   0x4   :  { %s37_s18 = sshll.u32 %s839_s17, 4  ;;  %s25_s20 = sshll.u32 %s840_s19, 4  ;;  %s38_s18 = int_to_ptr.vmem [resolvable:$true] %s37_s18  ;;  %s910_s20 = int_to_ptr.vmem [resolvable:$true] %s25_s20 }
   0x5   :  { %s721_s23 = scalar_lea.hbm %s1048_s1, 1024 }
   0x6   :  { %p722_p0 = scmp.ne.s32.totalorder %s1048_s1, %s721_s23  ;;  %p725_p1 = scmp.lt.u32.totalorder %s721_s23, %s1048_s1 }
   0x8   :  { %p727_p2 = pnand %p725_p1, %p722_p0 }
   0xa   :  { %730 = shalt.err (!%p727_p2)
}
   0xb   :  { %s731_s28 = scalar_lea.vmem %s38_s18, 1024  ;;  %p736_p4 = scmp.lt.s32.totalorder %s38_s18, %s38_s18 }
   0xc   :  { %p732_p3 = scmp.ne.s32.totalorder %s38_s18, %s731_s28  ;;  %p737_p5 = scmp.lt.s32.totalorder %s731_s28, %s731_s28 }
   0xe   :  { %p738_p6 = por %p737_p5, %p736_p4 }
  0x10   :  { %p739_p7 = pnand %p738_p6, %p732_p3 }
  0x12   :  { %742 = shalt.err (!%p739_p7)
}
  0x13   :  { %s841_s29 = smov 64   ;;  %s842_s30 = smov 4  }
  0x14   :  { %43 = dma.hbm_to_vmem [thread:$0]  %s1048_s1, 1024, %s38_s18, [#allocation6], %s841_s29, %s841_s29, %s842_s30  }
  0x15   :  { %s743_s16 = scalar_lea.hbm %s1047_s0, 128 }
  0x16   :  { %p744_p8 = scmp.ne.s32.totalorder %s1047_s0, %s743_s16  ;;  %p747_p9 = scmp.lt.u32.totalorder %s743_s16, %s1047_s0 }
  0x18   :  { %p749_p10 = pnand %p747_p9, %p744_p8 }
  0x1a   :  { %752 = shalt.err (!%p749_p10)
}
  0x1b   :  { %s753_s23 = scalar_lea.vmem %s910_s20, 128  ;;  %p758_p12 = scmp.lt.s32.totalorder %s910_s20, %s910_s20 }
  0x1c   :  { %p754_p11 = scmp.ne.s32.totalorder %s910_s20, %s753_s23  ;;  %p759_p13 = scmp.lt.s32.totalorder %s753_s23, %s753_s23 }
  0x1e   :  { %p760_p0 = por %p759_p13, %p758_p12 }
  0x20   :  { %p761_p1 = pnand %p760_p0, %p754_p11 }
  0x22   :  { %764 = shalt.err (!%p761_p1)
}
  0x23   :  { %31 = dma.hbm_to_vmem [thread:$0]  %s1047_s0, 128, %s910_s20, [#allocation3], %s841_s29, %s841_s29, %s842_s30  }
  0x24   :  { %s843_s24 = smov [#allocation7]   ;;  %s844_s26 = smov [#allocation8]  }
  0x25   :  { %s55_s25 = sshll.u32 %s843_s24, 4  ;;  %s73_s27 = sshll.u32 %s844_s26, 4  ;;  %s56_s25 = int_to_ptr.vmem [resolvable:$true] %s55_s25  ;;  %s947_s27 = int_to_ptr.vmem [resolvable:$true] %s73_s27 }
  0x26   :  { %s765_s13 = scalar_lea.hbm %s1052_s5, 1024 }
  0x27   :  { %p766_p2 = scmp.ne.s32.totalorder %s1052_s5, %s765_s13  ;;  %p769_p3 = scmp.lt.u32.totalorder %s765_s13, %s1052_s5 }
  0x29   :  { %p771_p4 = pnand %p769_p3, %p766_p2 }
  0x2b   :  { %774 = shalt.err (!%p771_p4)
}
  0x2c   :  { %s775_s0 = scalar_lea.vmem %s56_s25, 1024  ;;  %p780_p6 = scmp.lt.s32.totalorder %s56_s25, %s56_s25 }
  0x2d   :  { %p776_p5 = scmp.ne.s32.totalorder %s56_s25, %s775_s0  ;;  %p781_p7 = scmp.lt.s32.totalorder %s775_s0, %s775_s0 }
  0x2f   :  { %p782_p8 = por %p781_p7, %p780_p6 }
  0x31   :  { %p783_p9 = pnand %p782_p8, %p776_p5 }
  0x33   :  { %786 = shalt.err (!%p783_p9)
}
  0x34   :  { %61 = dma.hbm_to_vmem [thread:$0]  %s1052_s5, 1024, %s56_s25, [#allocation6], %s841_s29, %s841_s29, %s842_s30  }
  0x35   :  { %s787_s23 = scalar_lea.hbm %s1056_s9, 1024 }
  0x36   :  { %p788_p10 = scmp.ne.s32.totalorder %s1056_s9, %s787_s23  ;;  %p791_p11 = scmp.lt.u32.totalorder %s787_s23, %s1056_s9 }
  0x38   :  { %p793_p12 = pnand %p791_p11, %p788_p10 }
  0x3a   :  { %796 = shalt.err (!%p793_p12)
}
  0x3b   :  { %s797_s28 = scalar_lea.vmem %s947_s27, 1024  ;;  %p802_p0 = scmp.lt.s32.totalorder %s947_s27, %s947_s27 }
  0x3c   :  { %p798_p13 = scmp.ne.s32.totalorder %s947_s27, %s797_s28  ;;  %p803_p1 = scmp.lt.s32.totalorder %s797_s28, %s797_s28 }
  0x3e   :  { %p804_p2 = por %p803_p1, %p802_p0 }
  0x40   :  { %p805_p3 = pnand %p804_p2, %p798_p13 }
  0x42   :  { %808 = shalt.err (!%p805_p3)
}
  0x43   :  { %79 = dma.hbm_to_vmem [thread:$0]  %s1056_s9, 1024, %s947_s27, [#allocation9], %s841_s29, %s841_s29, %s842_s30  }
  0x44   :  { %831 = dma.done.wait [#allocation3], 128  }
  0x45   :  { %832 = vsyncadd [#allocation3], 4294967168 }
  0x46   :  { %833 = dma.done.wait [#allocation6], 2048  }
  0x47   :  { %834 = vsyncadd [#allocation6], 4294965248 }
  0x48   :  { %835 = dma.done.wait [#allocation9], 1024  }
  0x49   :  { %836 = vsyncadd [#allocation9], 4294966272  ;;  %v845_v0 = vmov 0.0   ;;  %vm846_vm0 = vmmov 0   ;;  %v688_v1 = vld [vmem:[#allocation5] sm:$0xff]   ;;  %v689_v2 = vld [vmem:[#allocation5 + $0x8] sm:$0xff]  }
  0x4a   :  { %617 = vmatprep.subr.bf16.mxu0 %v845_v0  ;;  %633 = vmatprep.mubr.msk.bf16.mxu0 %vm846_vm0, %v845_v0  ;;  %v690_v3 = vld [vmem:[#allocation5 + $0x10] sm:$0xff]   ;;  %v691_v4 = vld [vmem:[#allocation5 + $0x18] sm:$0xff]   ;;  %v692_v5 = vld [vmem:[#allocation5 + $0x20] sm:$0xff]   ;;  %s847_s17 = smov [#allocation10]  }
  0x4b   :  { %637 = vmatprep.subr.bf16.mxu1 %v845_v0  ;;  %653 = vmatprep.mubr.msk.bf16.mxu1 %vm846_vm0, %v845_v0  ;;  %v693_v6 = vld [vmem:[#allocation5 + $0x28] sm:$0xff]   ;;  %v694_v7 = vld [vmem:[#allocation5 + $0x30] sm:$0xff]   ;;  %v695_v8 = vld [vmem:[#allocation5 + $0x38] sm:$0xff]   ;;  %s544_s0 = sshll.u32 %s847_s17, 4  ;;  %s545_s0 = int_to_ptr.vmem [resolvable:$true] %s544_s0 }
  0x4c   :  { %618 = vmatpush3.bf16.msra.mxu0 %v688_v1  ;;  %v696_v9 = vld [vmem:[#allocation2] sm:$0xff]   ;;  %v697_v19 = vld [vmem:[#allocation7] sm:$0xff]   ;;  %v698_v20 = vld [vmem:[#allocation7 + $0x8] sm:$0xff]   ;;  %p814_p5 = scmp.lt.s32.totalorder %s545_s0, %s545_s0 }
  0x4d   :  { %619 = vmatprep.subr.bf16.mxu0 %v845_v0  ;;  %v558_v10 = vld [vmem:[%s1049_s2] ss:$0 sm:$0xff]  ;;  %638 = vmatpush3.bf16.msra.mxu1 %v697_v19  ;;  %v699_v21 = vld [vmem:[#allocation7 + $0x10] sm:$0xff]   ;;  %v701_v23 = vld [vmem:[#allocation7 + $0x20] sm:$0xff]  }
  0x4e   :  { %639 = vmatprep.subr.bf16.mxu1 %v845_v0  ;;  %v700_v22 = vld [vmem:[#allocation7 + $0x18] sm:$0xff]   ;;  %v702_v24 = vld [vmem:[#allocation7 + $0x28] sm:$0xff]   ;;  %v703_v25 = vld [vmem:[#allocation7 + $0x30] sm:$0xff]  }
  0x4f   :  { %v704_v26 = vld [vmem:[#allocation7 + $0x38] sm:$0xff]  }
  0x50   :  { %620 = vmatpush3.bf16.msra.mxu0 %v689_v2  ;;  %v568_v43 = vld [vmem:[%s1050_s3] ss:$0 sm:$0xff] }
  0x51   :  { %621 = vmatprep.subr.bf16.mxu0 %v845_v0  ;;  %640 = vmatpush3.bf16.msra.mxu1 %v698_v20  ;;  %v569_v49 = vld [vmem:[%s1051_s4] ss:$0 sm:$0xff] }
  0x52   :  { %641 = vmatprep.subr.bf16.mxu1 %v845_v0  ;;  %v570_v58 = vld [vmem:[%s1053_s6] ss:$0 sm:$0xff] }
  0x54   :  { %622 = vmatpush3.bf16.msra.mxu0 %v690_v3 }
  0x55   :  { %623 = vmatprep.subr.bf16.mxu0 %v845_v0  ;;  %642 = vmatpush3.bf16.msra.mxu1 %v699_v21 }
  0x56   :  { %643 = vmatprep.subr.bf16.mxu1 %v845_v0 }
  0x58   :  { %624 = vmatpush3.bf16.msra.mxu0 %v691_v4  ;;  %v705_v4 = vld [vmem:[#allocation8] sm:$0xff]  }
  0x59   :  { %625 = vmatprep.subr.bf16.mxu0 %v845_v0  ;;  %644 = vmatpush3.bf16.msra.mxu1 %v700_v22 }
  0x5a   :  { %645 = vmatprep.subr.bf16.mxu1 %v845_v0 }
  0x5c   :  { %626 = vmatpush3.bf16.msra.mxu0 %v692_v5  ;;  %v706_v5 = vld [vmem:[#allocation8 + $0x8] sm:$0xff]  }
  0x5d   :  { %627 = vmatprep.subr.bf16.mxu0 %v845_v0  ;;  %646 = vmatpush3.bf16.msra.mxu1 %v701_v23 }
  0x5e   :  { %647 = vmatprep.subr.bf16.mxu1 %v845_v0 }
  0x60   :  { %628 = vmatpush3.bf16.msra.mxu0 %v693_v6  ;;  %v707_v6 = vld [vmem:[#allocation8 + $0x10] sm:$0xff]  }
  0x61   :  { %629 = vmatprep.subr.bf16.mxu0 %v845_v0  ;;  %648 = vmatpush3.bf16.msra.mxu1 %v702_v24 }
  0x62   :  { %649 = vmatprep.subr.bf16.mxu1 %v845_v0 }
  0x64   :  { %630 = vmatpush3.bf16.msra.mxu0 %v694_v7  ;;  %v708_v7 = vld [vmem:[#allocation8 + $0x18] sm:$0xff]  }
  0x65   :  { %631 = vmatprep.subr.bf16.mxu0 %v845_v0  ;;  %650 = vmatpush3.bf16.msra.mxu1 %v703_v25 }
  0x66   :  { %651 = vmatprep.subr.bf16.mxu1 %v845_v0 }
  0x68   :  { %632 = vmatpush3.bf16.msra.mxu0 %v695_v8  ;;  %v709_v8 = vld [vmem:[#allocation8 + $0x20] sm:$0xff]  }
  0x69   :  { %657 = vmatprep.subr.bf16.mxu0 %v845_v0  ;;  %652 = vmatpush3.bf16.msra.mxu1 %v704_v26 }
  0x6b   :  { %634 = vmatmul.mubr.bf16.vlgmr.msra.gmra.mrb[0].mxu0 %v696_v9  ;;  %v710_v9 = vld [vmem:[#allocation8 + $0x28] sm:$0xff]  }
  0x6c   :  { %673 = vmatprep.mubr.msk.bf16.mxu0 %vm846_vm0, %v845_v0  ;;  %658 = vmatpush3.bf16.msra.mxu0 %v705_v4 }
  0x6d   :  { %659 = vmatprep.subr.bf16.mxu0 %v845_v0 }
  0x70   :  { %660 = vmatpush3.bf16.msra.mxu0 %v706_v5 }
  0x71   :  { %661 = vmatprep.subr.bf16.mxu0 %v845_v0 }
  0x74   :  { %662 = vmatpush3.bf16.msra.mxu0 %v707_v6 }
  0x75   :  { %663 = vmatprep.subr.bf16.mxu0 %v845_v0 }
  0x78   :  { %664 = vmatpush3.bf16.msra.mxu0 %v708_v7 }
  0x79   :  { %665 = vmatprep.subr.bf16.mxu0 %v845_v0 }
  0x7c   :  { %666 = vmatpush3.bf16.msra.mxu0 %v709_v8 }
  0x7d   :  { %667 = vmatprep.subr.bf16.mxu0 %v845_v0 }
  0x80   :  { %668 = vmatpush3.bf16.msra.mxu0 %v710_v9 }
  0x81   :  { %669 = vmatprep.subr.bf16.mxu0 %v845_v0 }
 0x13e   :  { %v208_v11 = vpop.f32.mrb[0].mxu0 }
 0x13f   :  { %v209_v12 = vadd.f32 %v558_v10, %v208_v11  ;;  %v635_v13 = vpop.f32.mrb[1].mxu0  ;;  %v712_v11 = vld [vmem:[#allocation8 + $0x38] sm:$0xff]  }
 0x140   :  { %v211_v14 = vpop.f32.mrb[2].mxu0 }
 0x141   :  { %v212_v15 = vadd.f32 %v558_v10, %v211_v14  ;;  %217 = vadd.xlane.f32.xlu0 %v209_v12  ;;  %v636_v16 = vpop.f32.mrb[3].mxu0  ;;  %v223_v17 = vmul.f32 %v209_v12, %v209_v12  ;;  %v711_v10 = vld [vmem:[#allocation8 + $0x30] sm:$0xff]  }
 0x142   :  { %670 = vmatpush3.bf16.msra.mxu0 %v711_v10 }
 0x143   :  { %225 = vadd.xlane.f32.xlu1 %v223_v17  ;;  %v224_v18 = vmul.f32 %v212_v15, %v212_v15  ;;  %671 = vmatprep.subr.bf16.mxu0 %v845_v0  ;;  %v579_v0 = vld [vmem:[%s1054_s7] ss:$0 sm:$0xff] }
 0x145   :  { %219 = vadd.xlane.f32.xlu0 %v212_v15 }
 0x146   :  { %672 = vmatpush3.bf16.msra.mxu0 %v712_v11 }
 0x147   :  { %227 = vadd.xlane.f32.xlu1 %v224_v18 }
 0x1ce   :  { %v218_v27 = vpop.xlane.xlu0 %217 }
 0x1cf   :  { %v221_v28 = vmul.f32 0.03125, %v218_v27 }
 0x1d0   :  { %v226_v29 = vpop.xlane.xlu1 %225 }
 0x1d1   :  { %v231_v30 = vmul.f32 %v221_v28, %v221_v28  ;;  %v229_v31 = vmul.f32 0.03125, %v226_v29  ;;  %v241_v45 = vsub.f32 %v209_v12, %v221_v28 }
 0x1d2   :  { %v220_v32 = vpop.xlane.xlu0 %219 }
 0x1d3   :  { %v233_v33 = vsub.f32 %v229_v31, %v231_v30  ;;  %v222_v34 = vmul.f32 0.03125, %v220_v32  ;;  %v580_v32 = vld [vmem:[%s1055_s8] ss:$0 sm:$0xff]  ;;  %s809_s8 = scalar_lea.vmem %s545_s0, 256 }
 0x1d4   :  { %v228_v35 = vpop.xlane.xlu1 %227  ;;  %p810_p4 = scmp.ne.s32.totalorder %s545_s0, %s809_s8  ;;  %p815_p6 = scmp.lt.s32.totalorder %s809_s8, %s809_s8 }
 0x1d5   :  { %v235_v36 = vmax.f32 %v233_v33, 0.0  ;;  %v232_v37 = vmul.f32 %v222_v34, %v222_v34  ;;  %v230_v38 = vmul.f32 0.03125, %v228_v35  ;;  %v242_v50 = vsub.f32 %v212_v15, %v222_v34 }
 0x1d6   :  { %p816_p7 = por %p815_p6, %p814_p5 }
 0x1d7   :  { %v237_v39 = vadd.f32 1e-05, %v235_v36  ;;  %v234_v40 = vsub.f32 %v230_v38, %v232_v37 }
 0x1d8   :  { %p817_p8 = pnand %p816_p7, %p810_p4 }
 0x1d9   :  { %713 = vrsqrt.f32 %v237_v39  ;;  %v236_v41 = vmax.f32 %v234_v40, 0.0 }
 0x1db   :  { %v238_v42 = vadd.f32 1e-05, %v236_v41 }
 0x1dd   :  { %715 = vrsqrt.f32 %v238_v42  ;;  %v581_v42 = vld [vmem:[%s1057_s10] ss:$0 sm:$0xff] }
 0x1e3   :  { %v714_v44 = vpop.eup %713 }
 0x1e4   :  { %v249_v46 = vmul.f32 %v714_v44, %v568_v43 }
 0x1e6   :  { %v251_v47 = vmul.f32 %v249_v46, %v241_v45 }
 0x1e7   :  { %v716_v48 = vpop.eup %715 }
 0x1e8   :  { %v250_v51 = vmul.f32 %v716_v48, %v568_v43  ;;  %v259_v53 = vadd.f32 %v569_v49, %v251_v47 }
 0x1ea   :  { %v252_v52 = vmul.f32 %v250_v51, %v242_v50  ;;  %v261_v55 = vmax.f32 %v259_v53, 0.0 }
 0x1ec   :  { %v260_v54 = vadd.f32 %v569_v49, %v252_v52 }
 0x1ee   :  { %v262_v56 = vmax.f32 %v260_v54, 0.0 }
 0x1f0   :  { %v263_v57 = vpack.c.bf16 %v262_v56, %v261_v55 }
 0x1f2   :  { %654 = vmatmul.mubr.bf16.vlgmr.msra.gmra.mrb[0].mxu1 %v263_v57 }
 0x2c5   :  { %v369_v59 = vpop.f32.mrb[0].mxu1 }
 0x2c6   :  { %v370_v60 = vadd.f32 %v570_v58, %v369_v59  ;;  %v655_v61 = vpop.f32.mrb[1].mxu1 }
 0x2c7   :  { %v372_v62 = vpop.f32.mrb[2].mxu1 }
 0x2c8   :  { %v373_v63 = vadd.f32 %v570_v58, %v372_v62  ;;  %378 = vadd.xlane.f32.xlu0 %v370_v60  ;;  %v656_v1 = vpop.f32.mrb[3].mxu1  ;;  %v384_v2 = vmul.f32 %v370_v60, %v370_v60 }
 0x2ca   :  { %380 = vadd.xlane.f32.xlu1 %v373_v63  ;;  %v385_v3 = vmul.f32 %v373_v63, %v373_v63 }
 0x2cc   :  { %386 = vadd.xlane.f32.xlu0 %v384_v2 }
 0x2ce   :  { %388 = vadd.xlane.f32.xlu1 %v385_v3 }
 0x355   :  { %v379_v12 = vpop.xlane.xlu0 %378 }
 0x356   :  { %v382_v13 = vmul.f32 0.03125, %v379_v12 }
 0x357   :  { %v381_v14 = vpop.xlane.xlu1 %380 }
 0x358   :  { %v383_v15 = vmul.f32 0.03125, %v381_v14  ;;  %v392_v17 = vmul.f32 %v382_v13, %v382_v13  ;;  %v402_v29 = vsub.f32 %v370_v60, %v382_v13 }
 0x359   :  { %v387_v16 = vpop.xlane.xlu0 %386 }
 0x35a   :  { %v390_v18 = vmul.f32 0.03125, %v387_v16  ;;  %v393_v20 = vmul.f32 %v383_v15, %v383_v15  ;;  %v403_v33 = vsub.f32 %v373_v63, %v383_v15 }
 0x35b   :  { %v389_v19 = vpop.xlane.xlu1 %388 }
 0x35c   :  { %v394_v21 = vsub.f32 %v390_v18, %v392_v17  ;;  %v391_v22 = vmul.f32 0.03125, %v389_v19 }
 0x35e   :  { %v396_v23 = vmax.f32 %v394_v21, 0.0  ;;  %v395_v24 = vsub.f32 %v391_v22, %v393_v20 }
 0x360   :  { %v398_v25 = vadd.f32 1e-05, %v396_v23  ;;  %v397_v26 = vmax.f32 %v395_v24, 0.0 }
 0x362   :  { %717 = vrsqrt.f32 %v398_v25  ;;  %v399_v27 = vadd.f32 1e-05, %v397_v26 }
 0x364   :  { %719 = vrsqrt.f32 %v399_v27 }
 0x36c   :  { %v718_v28 = vpop.eup %717 }
 0x36d   :  { %v410_v30 = vmul.f32 %v718_v28, %v579_v0 }
 0x36e   :  { %v720_v31 = vpop.eup %719 }
 0x36f   :  { %v411_v34 = vmul.f32 %v720_v31, %v579_v0  ;;  %v412_v35 = vmul.f32 %v410_v30, %v402_v29 }
 0x371   :  { %v413_v36 = vmul.f32 %v411_v34, %v403_v33  ;;  %v420_v37 = vadd.f32 %v580_v32, %v412_v35 }
 0x373   :  { %v421_v38 = vadd.f32 %v580_v32, %v413_v36  ;;  %v422_v39 = vmax.f32 %v420_v37, 0.0 }
 0x375   :  { %v423_v40 = vmax.f32 %v421_v38, 0.0 }
 0x377   :  { %v424_v41 = vpack.c.bf16 %v423_v40, %v422_v39 }
 0x379   :  { %674 = vmatmul.mubr.bf16.vlgmr.msra.gmra.mrb[4].mxu0 %v424_v41 }
 0x44c   :  { %v530_v43 = vpop.f32.mrb[4].mxu0 }
 0x44d   :  { %v531_v44 = vadd.f32 %v581_v42, %v530_v43  ;;  %v675_v45 = vpop.f32.mrb[5].mxu0 }
 0x44e   :  { %v533_v46 = vpop.f32.mrb[6].mxu0 }
 0x44f   :  { %537 = vst [vmem:[#allocation10] sm:$0xff] %v531_v44  ;;  %v534_v47 = vadd.f32 %v581_v42, %v533_v46  ;;  %v676_v48 = vpop.f32.mrb[7].mxu0 }
 0x451   :  { %538 = vst [vmem:[#allocation10 + $0x8] sm:$0xff] %v534_v47 }
 0x452   :  { %820 = shalt.err (!%p817_p8)
}
 0x453   :  { %s821_s19 = scalar_lea.hbm %s1058_s11, 256 }
 0x454   :  { %p822_p9 = scmp.ne.s32.totalorder %s1058_s11, %s821_s19  ;;  %p825_p10 = scmp.lt.u32.totalorder %s821_s19, %s1058_s11 }
 0x456   :  { %p827_p11 = pnand %p825_p10, %p822_p9 }
 0x458   :  { %830 = shalt.err (!%p827_p11)
}
 0x459   :  { %s848_s18 = smov 128   ;;  %s849_s24 = smov 8  }
 0x45a   :  { %550 = dma.vmem_to_hbm [thread:$0]  %s545_s0, 256, %s1058_s11, [#allocation4], %s848_s18, %s848_s18, %s849_s24  }
 0x45b   :  { %837 = dma.done.wait [#allocation4], 256  }
 0x45c   :  { %838 = vsyncadd [#allocation4], 4294967040 }
 0x45d   :  { %554 = vsyncpa [#allocation3], 1 }
 0x45e   :  { %555 = vsyncpa [#allocation6], 1 }
 0x45f   :  { %556 = vsyncpa [#allocation9], 1 }
 0x460   :  { %557 = vsyncpa [#allocation4], 1 }

</bundles_post_ra>
